<compile_context>
chip_gen: v6e
topology: v6e:2x2x1
jax: 0.10.0
libtpu: 0.0.40
codegen_flags: <defaults>
</compile_context>

<pallas_src>
import functools

import jax
import jax.numpy as jnp
from jax.experimental import pallas as pl
from jax.experimental.pallas import tpu as pltpu


def _round_up(x, m):
    return ((x + m - 1) // m) * m


def expert_kernel(x_ref, w1_ref, b1_ref, w2_ref, b2_ref, o_ref, acc_ref):
    """One (batch-tile, hidden-tile) grid step of fc1 -> ReLU -> fc2."""
    h = pl.program_id(1)

    @pl.when(h == 0)
    def _():
        acc_ref[...] = jnp.zeros_like(acc_ref)

    # fc1 partial: [TB, I_pad] @ [I_pad, TH] -> f32 [TB, TH] on the MXU.
    hidden = jnp.dot(x_ref[...], w1_ref[...],
                     preferred_element_type=jnp.float32,
                     precision=jax.lax.Precision.HIGHEST)
    hidden = jnp.maximum(hidden + b1_ref[...], 0.0)  # bias + ReLU, in f32.

    # fc2 partial: accumulate [TB, TH] @ [TH, O_pad] into the f32 scratch.
    acc_ref[...] += jnp.dot(hidden.astype(w2_ref.dtype), w2_ref[...],
                            preferred_element_type=jnp.float32,
                            precision=jax.lax.Precision.HIGHEST)

    @pl.when(h == pl.num_programs(1) - 1)
    def _():
        o_ref[...] = (acc_ref[...] + b2_ref[...]).astype(o_ref.dtype)


def prepare_expert_params(w1, b1, w2, b2, *, hidden_tile=512):
    """Pad weights/biases ONCE (outside the per-call path).

    w1: [I, H], b1: [1, H], w2: [H, O], b2: [1, O].  Zero padding keeps the
    math exact.  H_pad is made divisible by the effective hidden tile so the
    reduction grid axis is uniform.
    """
    I, H = w1.shape
    O = w2.shape[1]
    I_pad = _round_up(I, 128)
    TH = min(_round_up(H, 256), hidden_tile)
    H_pad = _round_up(H, TH)
    O_pad = _round_up(O, 256)

    w1p = jnp.pad(w1, ((0, I_pad - I), (0, H_pad - H)))
    b1p = jnp.pad(b1.reshape(1, -1), ((0, 0), (0, H_pad - H)))
    w2p = jnp.pad(w2, ((0, H_pad - H), (0, O_pad - O)))
    b2p = jnp.pad(b2.reshape(1, -1), ((0, 0), (0, O_pad - O)))
    return w1p, b1p, w2p, b2p


@functools.partial(jax.jit, static_argnames=("out_dim", "batch_tile", "hidden_tile"))
def expert_forward(x, w1p, b1p, w2p, b2p, *, out_dim, batch_tile=256,
                   hidden_tile=512):
    """Fused Expert forward.  x: [B, I]; w1p/b1p/w2p/b2p from prepare_expert_params."""
    B, I = x.shape
    I_pad, H_pad = w1p.shape
    O_pad = w2p.shape[1]

    # Hidden (reduction) tile — must match prepare_expert_params' choice.
    TH = min(H_pad, hidden_tile)
    assert H_pad % TH == 0, (H_pad, TH)

    # Dtype-aware sublane alignment for the batch tile.
    itemsize = jnp.dtype(x.dtype).itemsize
    sublane = {4: 8, 2: 16, 1: 32}.get(itemsize, 8)
    if B > batch_tile:
        TB = batch_tile
    else:
        TB = _round_up(B, sublane)
        # Prefer >= 2 batch tiles when B allows, so the "parallel" axis can
        # feed both TensorCores on v7x (megacore).
        if B >= 4 * sublane:
            TB = _round_up((B + 1) // 2, sublane)
    B_pad = _round_up(B, TB)

    # Only x is padded per call (weights were pre-padded once).
    xp = x
    if B_pad != B or I_pad != I:
        xp = jnp.pad(x, ((0, B_pad - B), (0, I_pad - I)))

    grid = (B_pad // TB, H_pad // TH)

    # VMEM footprint of one grid step (default double-buffering on streamed
    # operands, single f32 accumulator + hidden intermediate), +25% headroom.
    w_itemsize = jnp.dtype(w1p.dtype).itemsize
    footprint = (
        2 * TB * I_pad * itemsize          # x tile (double-buffered)
        + 2 * I_pad * TH * w_itemsize      # w1 tile
        + 2 * 8 * TH * w_itemsize          # b1 tile (sublane-padded)
        + 2 * TH * O_pad * w_itemsize      # w2 tile
        + 2 * 8 * O_pad * w_itemsize       # b2 tile
        + 2 * TB * O_pad * itemsize        # output tile
        + TB * O_pad * 4                   # f32 accumulator scratch
        + TB * TH * 4                      # f32 hidden intermediate
    )
    vmem_limit = int(min(max(footprint * 1.25, 32 * 1024 * 1024),
                         128 * 1024 * 1024))

    flops = 2 * B_pad * (I_pad * H_pad + H_pad * O_pad)
    bytes_accessed = (xp.size * xp.dtype.itemsize
                      + w1p.size * w1p.dtype.itemsize
                      + b1p.size * b1p.dtype.itemsize
                      + w2p.size * w2p.dtype.itemsize
                      + b2p.size * b2p.dtype.itemsize
                      + B_pad * O_pad * x.dtype.itemsize)

    out_padded = pl.pallas_call(
        expert_kernel,
        out_shape=jax.ShapeDtypeStruct((B_pad, O_pad), x.dtype),
        grid=grid,
        in_specs=[
            pl.BlockSpec((TB, I_pad), lambda i, h: (i, 0)),    # x: resident over h
            pl.BlockSpec((I_pad, TH), lambda i, h: (0, h)),    # w1: stream H tiles
            pl.BlockSpec((1, TH), lambda i, h: (0, h)),        # b1: stream H tiles
            pl.BlockSpec((TH, O_pad), lambda i, h: (h, 0)),    # w2: stream H tiles
            pl.BlockSpec((1, O_pad), lambda i, h: (0, 0)),     # b2: constant
        ],
        out_specs=pl.BlockSpec((TB, O_pad), lambda i, h: (i, 0)),
        scratch_shapes=[pltpu.VMEM((TB, O_pad), jnp.float32)],
        compiler_params=pltpu.CompilerParams(
            dimension_semantics=("parallel", "arbitrary"),
            vmem_limit_bytes=vmem_limit,
        ),
        cost_estimate=pl.CostEstimate(
            flops=flops, transcendentals=0, bytes_accessed=bytes_accessed),
    )(xp, w1p, b1p, w2p, b2p)

    # Slice away batch / output-lane padding.
    return out_padded[:B, :out_dim]


def init_expert_params(key, input_dim, hidden_dim, output_dim, dtype=jnp.float32):
    """Deterministic init matching nn.Linear's default U(-1/sqrt(fan_in), 1/sqrt(fan_in))."""
    k1, k2, k3, k4 = jax.random.split(key, 4)
    lim1 = 1.0 / jnp.sqrt(jnp.float32(input_dim))
    lim2 = 1.0 / jnp.sqrt(jnp.float32(hidden_dim))
    w1 = jax.random.uniform(k1, (input_dim, hidden_dim), dtype, -lim1, lim1)
    b1 = jax.random.uniform(k2, (1, hidden_dim), dtype, -lim1, lim1)
    w2 = jax.random.uniform(k3, (hidden_dim, output_dim), dtype, -lim2, lim2)
    b2 = jax.random.uniform(k4, (1, output_dim), dtype, -lim2, lim2)
    return w1, b1, w2, b2


if __name__ == "__main__":
    input_dim, hidden_dim, output_dim = 32, 64, 16
    batch = 8

    key = jax.random.PRNGKey(0)
    kx, kp = jax.random.split(key)
    x = jax.random.normal(kx, (batch, input_dim), jnp.float32)
    w1, b1, w2, b2 = init_expert_params(kp, input_dim, hidden_dim, output_dim)

    # Pad weights once (outside the per-call path), then run the fused kernel.
    w1p, b1p, w2p, b2p = prepare_expert_params(w1, b1, w2, b2)
    out = expert_forward(x, w1p, b1p, w2p, b2p, out_dim=output_dim)
    out = jax.block_until_ready(out)

    # Pure-JAX reference, HIGHEST precision to match the kernel's f32 MXU path.
    hp = jax.lax.Precision.HIGHEST
    hidden_ref = jnp.maximum(jnp.dot(x, w1, precision=hp) + b1, 0.0)
    ref = jnp.dot(hidden_ref, w2, precision=hp) + b2

    assert out.shape == (batch, output_dim), out.shape
    max_err = float(jnp.max(jnp.abs(out - ref)))
    assert jnp.allclose(out, ref, atol=1e-5, rtol=1e-5), max_err

    print("KERNEL_OK")
</pallas_src>

<mosaic_0001>
module attributes {stable_mosaic.version = 11 : i64} {
  func.func @expert_kernel(%arg0: i32, %arg1: i32, %arg2: memref<8x128xf32, #tpu.memory_space<vmem>>, %arg3: memref<128x256xf32, #tpu.memory_space<vmem>>, %arg4: memref<1x256xf32, #tpu.memory_space<vmem>>, %arg5: memref<256x256xf32, #tpu.memory_space<vmem>>, %arg6: memref<1x256xf32, #tpu.memory_space<vmem>>, %arg7: memref<8x256xf32, #tpu.memory_space<vmem>>, %arg8: memref<8x256xf32, #tpu.memory_space<vmem>>) attributes {dimension_semantics = [#tpu.dimension_semantics<parallel>, #tpu.dimension_semantics<arbitrary>], iteration_bounds = array<i64: 1, 1>, scalar_prefetch = 0 : i64, scratch_operands = 1 : i64, tpu.core_type = #tpu.core_type<tc>, window_params = [{transform_indices = @transform_0, window_bounds = array<i64: 8, 128>}, {transform_indices = @transform_1, window_bounds = array<i64: 128, 256>}, {transform_indices = @transform_2, window_bounds = array<i64: 1, 256>}, {transform_indices = @transform_3, window_bounds = array<i64: 256, 256>}, {pipeline_mode = #tpu.pipeline_mode<synchronous>, transform_indices = @transform_4, window_bounds = array<i64: 1, 256>}, {transform_indices = @transform_5, window_bounds = array<i64: 8, 256>}]} {
    %c0_i32 = arith.constant 0 : i32
    %0 = arith.cmpi eq, %arg1, %c0_i32 : i32
    %1 = arith.extui %0 : i1 to i32
    %c0_i32_0 = arith.constant 0 : i32
    %2 = arith.cmpi ne, %1, %c0_i32_0 : i32
    scf.if %2 {
      %cst_16 = arith.constant 0.000000e+00 : f32
      %19 = vector.broadcast %cst_16 : f32 to vector<8x256xf32>
      %c0_17 = arith.constant 0 : index
      %c0_18 = arith.constant 0 : index
      %20 = vector.load %arg8[%c0_17, %c0_18] : memref<8x256xf32, #tpu.memory_space<vmem>>, vector<8x256xf32>
      tpu.vector_store %arg8[%c0_17, %c0_18], %19 {strides = array<i32>} : memref<8x256xf32, #tpu.memory_space<vmem>>, vector<8x256xf32>,
    } else {
    }
    %c0 = arith.constant 0 : index
    %c0_1 = arith.constant 0 : index
    %3 = vector.load %arg2[%c0, %c0_1] : memref<8x128xf32, #tpu.memory_space<vmem>>, vector<8x128xf32>
    %c0_2 = arith.constant 0 : index
    %c0_3 = arith.constant 0 : index
    %4 = vector.load %arg3[%c0_2, %c0_3] : memref<128x256xf32, #tpu.memory_space<vmem>>, vector<128x256xf32>
    %cst = arith.constant dense<0.000000e+00> : vector<8x256xf32>
    %5 = tpu.matmul %3, %4, %cst {dimension_numbers = #tpu.dot_dimension_numbers<[1], [0], [0], [1], [0, 0, 1, 1], [], []>, precision = #tpu.contract_precision<fp32>} : vector<8x128xf32>, vector<128x256xf32>, vector<8x256xf32> -> vector<8x256xf32>
    %c0_4 = arith.constant 0 : index
    %c0_5 = arith.constant 0 : index
    %6 = vector.load %arg4[%c0_4, %c0_5] : memref<1x256xf32, #tpu.memory_space<vmem>>, vector<1x256xf32>
    %7 = vector.broadcast %6 : vector<1x256xf32> to vector<8x256xf32>
    %8 = arith.addf %5, %7 : vector<8x256xf32>
    %cst_6 = arith.constant 0.000000e+00 : f32
    %9 = vector.broadcast %cst_6 : f32 to vector<8x256xf32>
    %10 = arith.maximumf %8, %9 : vector<8x256xf32>
    %c0_7 = arith.constant 0 : index
    %c0_8 = arith.constant 0 : index
    %11 = vector.load %arg8[%c0_7, %c0_8] : memref<8x256xf32, #tpu.memory_space<vmem>>, vector<8x256xf32>
    %c0_9 = arith.constant 0 : index
    %c0_10 = arith.constant 0 : index
    %12 = vector.load %arg5[%c0_9, %c0_10] : memref<256x256xf32, #tpu.memory_space<vmem>>, vector<256x256xf32>
    %cst_11 = arith.constant dense<0.000000e+00> : vector<8x256xf32>
    %13 = tpu.matmul %10, %12, %cst_11 {dimension_numbers = #tpu.dot_dimension_numbers<[1], [0], [0], [1], [0, 0, 1, 1], [], []>, precision = #tpu.contract_precision<fp32>} : vector<8x256xf32>, vector<256x256xf32>, vector<8x256xf32> -> vector<8x256xf32>
    %14 = arith.addf %11, %13 : vector<8x256xf32>
    %c0_12 = arith.constant 0 : index
    %c0_13 = arith.constant 0 : index
    %15 = vector.load %arg8[%c0_12, %c0_13] : memref<8x256xf32, #tpu.memory_space<vmem>>, vector<8x256xf32>
    tpu.vector_store %arg8[%c0_12, %c0_13], %14 {strides = array<i32>} : memref<8x256xf32, #tpu.memory_space<vmem>>, vector<8x256xf32>,
    %c0_i32_14 = arith.constant 0 : i32
    %16 = arith.cmpi eq, %arg1, %c0_i32_14 : i32
    %17 = arith.extui %16 : i1 to i32
    %c0_i32_15 = arith.constant 0 : i32
    %18 = arith.cmpi ne, %17, %c0_i32_15 : i32
    scf.if %18 {
      %c0_16 = arith.constant 0 : index
      %c0_17 = arith.constant 0 : index
      %19 = vector.load %arg8[%c0_16, %c0_17] : memref<8x256xf32, #tpu.memory_space<vmem>>, vector<8x256xf32>
      %c0_18 = arith.constant 0 : index
      %c0_19 = arith.constant 0 : index
      %20 = vector.load %arg6[%c0_18, %c0_19] : memref<1x256xf32, #tpu.memory_space<vmem>>, vector<1x256xf32>
      %21 = vector.broadcast %20 : vector<1x256xf32> to vector<8x256xf32>
      %22 = arith.addf %19, %21 : vector<8x256xf32>
      %c0_20 = arith.constant 0 : index
      %c0_21 = arith.constant 0 : index
      %23 = vector.load %arg7[%c0_20, %c0_21] : memref<8x256xf32, #tpu.memory_space<vmem>>, vector<8x256xf32>
      tpu.vector_store %arg7[%c0_20, %c0_21], %22 {strides = array<i32>} : memref<8x256xf32, #tpu.memory_space<vmem>>, vector<8x256xf32>,
    } else {
    }
    return
  }
  func.func @transform_0(%arg0: i32, %arg1: i32) -> (i32, i32) {
    %c0_i32 = arith.constant 0 : i32
    %c0_i32_0 = arith.constant 0 : i32
    return %arg0, %c0_i32 : i32, i32
  }
  func.func @transform_1(%arg0: i32, %arg1: i32) -> (i32, i32) {
    %c0_i32 = arith.constant 0 : i32
    %c0_i32_0 = arith.constant 0 : i32
    return %c0_i32, %arg1 : i32, i32
  }
  func.func @transform_2(%arg0: i32, %arg1: i32) -> (i32, i32) {
    %c0_i32 = arith.constant 0 : i32
    %c0_i32_0 = arith.constant 0 : i32
    return %c0_i32, %arg1 : i32, i32
  }
  func.func @transform_3(%arg0: i32, %arg1: i32) -> (i32, i32) {
    %c0_i32 = arith.constant 0 : i32
    %c0_i32_0 = arith.constant 0 : i32
    return %arg1, %c0_i32 : i32, i32
  }
  func.func @transform_4(%arg0: i32, %arg1: i32) -> (i32, i32) {
    %c0_i32 = arith.constant 0 : i32
    %c0_i32_0 = arith.constant 0 : i32
    %c0_i32_1 = arith.constant 0 : i32
    return %c0_i32, %c0_i32_0 : i32, i32
  }
  func.func @transform_5(%arg0: i32, %arg1: i32) -> (i32, i32) {
    %c0_i32 = arith.constant 0 : i32
    %c0_i32_0 = arith.constant 0 : i32
    return %arg0, %c0_i32 : i32, i32
  }
}

</mosaic_0001>

<bundles_post_ra>
// kernel: expert_forward.1
= control target key start
LH: loop header
LB: loop body
LE: loop exit
PB: predicated region body
PF: predicated region fallthrough
CT: control target
= control target key end

     0   :  { %10 = vsyncpa [#allocation4], 0  ;;  %s4028_s0 = inlined_call_operand.vmem [shape: f32[8,128], index: 0, kind: input, shape index: {}]   ;;  %s4029_s1 = inlined_call_operand.hbm [shape: f32[128,256], index: 1, kind: input, shape index: {}]   ;;  %s4030_s2 = inlined_call_operand.vmem [shape: f32[1,256], index: 2, kind: input, shape index: {}]   ;;  %s4031_s3 = inlined_call_operand.hbm [shape: f32[256,256], index: 3, kind: input, shape index: {}]   ;;  %s4032_s4 = inlined_call_operand.vmem [shape: f32[1,256], index: 4, kind: input, shape index: {}]   ;;  %s4033_s5 = inlined_call_operand.vmem [shape: f32[8,256], index: 5, kind: output, shape index: {}]  }
   0x1   :  { %11 = vsyncpa [#allocation6], 0  ;;  %s2386_s18 = smov [#allocation3]  }
   0x2   :  { %s19_s19 = sshll.u32 %s2386_s18, 4  ;;  %s20_s19 = int_to_ptr.vmem [resolvable:$true] %s19_s19 }
   0x3   :  { %s2350_s20 = scalar_lea.vmem %s20_s19, 4096  ;;  %p2355_p1 = scmp.lt.s32.totalorder %s20_s19, %s20_s19 }
   0x4   :  { %p2351_p0 = scmp.ne.s32.totalorder %s20_s19, %s2350_s20  ;;  %p2356_p2 = scmp.lt.s32.totalorder %s2350_s20, %s2350_s20 }
   0x6   :  { %p2357_p3 = por %p2356_p2, %p2355_p1 }
   0x8   :  { %p2358_p4 = pnand %p2357_p3, %p2351_p0 }
   0xa   :  { %2361 = shalt.err (!%p2358_p4)
}
   0xb   :  { %s2387_s21 = smov 256   ;;  %s2388_s22 = smov 16  }
   0xc   :  { %25 = dma.hbm_to_vmem [thread:$0]  %s4029_s1, 4096, %s20_s19, [#allocation4], %s2387_s21, %s2387_s21, %s2388_s22  }
   0xd   :  { %s2389_s25 = smov [#allocation5]  }
   0xe   :  { %s33_s26 = sshll.u32 %s2389_s25, 4  ;;  %s34_s26 = int_to_ptr.vmem [resolvable:$true] %s33_s26 }
   0xf   :  { %s2370_s27 = scalar_lea.vmem %s34_s26, 8192  ;;  %p2375_p6 = scmp.lt.s32.totalorder %s34_s26, %s34_s26 }
  0x10   :  { %p2371_p5 = scmp.ne.s32.totalorder %s34_s26, %s2370_s27  ;;  %p2376_p7 = scmp.lt.s32.totalorder %s2370_s27, %s2370_s27 }
  0x12   :  { %p2377_p8 = por %p2376_p7, %p2375_p6 }
  0x14   :  { %p2378_p9 = pnand %p2377_p8, %p2371_p5 }
  0x16   :  { %2381 = shalt.err (!%p2378_p9)
}
  0x17   :  { %39 = dma.hbm_to_vmem [thread:$0]  %s4031_s3, 8192, %s34_s26, [#allocation6], %s2387_s21, %s2387_s21, %s2388_s22  }
  0x18   :  { %2382 = dma.done.wait [#allocation4], 4096  }
  0x19   :  { %2383 = vsyncadd [#allocation4], 4294963200 }
  0x1a   :  { %2384 = dma.done.wait [#allocation6], 8192  }
  0x1b   :  { %2385 = vsyncadd [#allocation6], 4294959104  ;;  %v4048_v0 = vmov 0.0   ;;  %v86_v1 = vld [vmem:[#allocation3 + $0xf8] sm:$0xff]  ;;  %v85_v2 = vld [vmem:[#allocation3 + $0xf0] sm:$0xff] }
  0x1c   :  { %195 = vmatprep.mubr.f32.mxu0 %v4048_v0  ;;  %431 = vmatprep.mubr.f32.mxu1 %v4048_v0  ;;  %v84_v3 = vld [vmem:[#allocation3 + $0xe8] sm:$0xff]  ;;  %v2429_v4 = vand.u32 4294901760, %v86_v1  ;;  %v2431_v5 = vand.u32 4294901760, %v85_v2  ;;  %v83_v7 = vld [vmem:[#allocation3 + $0xe0] sm:$0xff]  ;;  %v82_v8 = vld [vmem:[#allocation3 + $0xd8] sm:$0xff] }
  0x1d   :  { %v2433_v6 = vand.u32 4294901760, %v84_v3  ;;  %v81_v9 = vld [vmem:[#allocation3 + $0xd0] sm:$0xff]  ;;  %v2435_v10 = vand.u32 4294901760, %v83_v7  ;;  %v2437_v11 = vand.u32 4294901760, %v82_v8  ;;  %v80_v13 = vld [vmem:[#allocation3 + $0xc8] sm:$0xff]  ;;  %v79_v14 = vld [vmem:[#allocation3 + $0xc0] sm:$0xff] }
  0x1e   :  { %v2439_v12 = vand.u32 4294901760, %v81_v9  ;;  %v78_v15 = vld [vmem:[#allocation3 + $0xb8] sm:$0xff]  ;;  %100 = vmatprep.subr.mxu0 %v2429_v4  ;;  %v2442_v16 = vand.u32 4294901760, %v80_v13  ;;  %v2444_v17 = vand.u32 4294901760, %v79_v14  ;;  %v2449_v19 = vsub.f32 %v86_v1, %v2429_v4  ;;  %v2451_v20 = vld [vmem:[#allocation3 + $0xb0] sm:$0xff]  ;;  %v2453_v21 = vld [vmem:[#allocation3 + $0xa8] sm:$0xff] }
  0x1f   :  { %v2446_v18 = vand.u32 4294901760, %v78_v15  ;;  %v2455_v22 = vld [vmem:[#allocation3 + $0xa0] sm:$0xff]  ;;  %102 = vmatpush1.msra.mxu0 %v2431_v5  ;;  %v2459_v23 = vand.u32 4294901760, %v2451_v20  ;;  %v2462_v24 = vsub.f32 %v85_v2, %v2431_v5  ;;  %v2465_v25 = vand.u32 4294901760, %v2453_v21  ;;  %v2470_v27 = vld [vmem:[#allocation3 + $0x98] sm:$0xff]  ;;  %v2472_v28 = vld [vmem:[#allocation3 + $0x90] sm:$0xff] }
  0x20   :  { %v2468_v26 = vsub.f32 %v84_v3, %v2433_v6  ;;  %v2474_v29 = vld [vmem:[#allocation3 + $0x88] sm:$0xff]  ;;  %104 = vmatprep.subr.mxu0 %v2433_v6  ;;  %v4046_v30 = vand.u32 4294901760, %v2449_v19  ;;  %v2479_v31 = vand.u32 4294901760, %v2455_v22  ;;  %v2482_v32 = vsub.f32 %v83_v7, %v2435_v10  ;;  %v2496_v38 = vld [vmem:[#allocation3 + $0x80] sm:$0xff]  ;;  %v2520_v47 = vld [vmem:[#allocation3 + $0x78] sm:$0xff] }
  0x21   :  { %v2485_v33 = vand.u32 4294901760, %v2470_v27  ;;  %106 = vmatpush1.msra.mxu0 %v2435_v10  ;;  %v4045_v34 = vand.u32 4294901760, %v2462_v24  ;;  %v2491_v36 = vsub.f32 %v82_v8, %v2437_v11  ;;  %v2494_v37 = vand.u32 4294901760, %v2472_v28  ;;  %v2530_v52 = vld [vmem:[#allocation3 + $0x70] sm:$0xff]  ;;  %v2537_v57 = vld [vmem:[#allocation3 + $0x68] sm:$0xff]  ;;  %v2549_v62 = vld [vmem:[#allocation3 + $0x60] sm:$0xff] }
  0x22   :  { %v4043_v35 = vand.u32 4294901760, %v2468_v26  ;;  %108 = vmatprep.subr.mxu0 %v2437_v11  ;;  %v210_v39 = vsub.f32 %v2449_v19, %v4046_v30  ;;  %v4041_v40 = vand.u32 4294901760, %v2482_v32  ;;  %v2504_v41 = vsub.f32 %v81_v9, %v2439_v12  ;;  %v2561_v7 = vld [vmem:[#allocation3 + $0x58] sm:$0xff] }
  0x23   :  { %4331 = vst [vmem:[#allocation9_spill] sm:$0xff] %v2485_v33  ;;  %4332 = vst [vmem:[#allocation10_spill] sm:$0xff] %v2494_v37  ;;  %v2507_v42 = vand.u32 4294901760, %v2474_v29  ;;  %110 = vmatpush1.msra.mxu0 %v2439_v12  ;;  %v216_v43 = vsub.f32 %v2462_v24, %v4045_v34  ;;  %v4040_v45 = vand.u32 4294901760, %v2491_v36  ;;  %v2518_v46 = vsub.f32 %v80_v13, %v2442_v16  ;;  %v2662_v34 = vld [vmem:[#allocation3 + $0x20] sm:$0xff] }
  0x24   :  { %v222_v44 = vsub.f32 %v2468_v26, %v4043_v35  ;;  %112 = vmatprep.subr.mxu0 %v2442_v16  ;;  %v211_v48 = vand.u32 4294901760, %v210_v39  ;;  %v228_v49 = vsub.f32 %v2482_v32, %v4041_v40  ;;  %v4038_v50 = vand.u32 4294901760, %v2504_v41  ;;  %v2652_v35 = vld [vmem:[#allocation3 + $0x28] sm:$0xff] }
  0x25   :  { %4333 = vst [vmem:[#allocation11_spill] sm:$0xff] %v2507_v42  ;;  %v2528_v51 = vand.u32 4294901760, %v2496_v38  ;;  %114 = vmatpush1.msra.mxu0 %v2444_v17  ;;  %v217_v53 = vand.u32 4294901760, %v216_v43  ;;  %v234_v55 = vsub.f32 %v2491_v36, %v4040_v45  ;;  %v4036_v56 = vand.u32 4294901760, %v2518_v46  ;;  %v2639_v45 = vld [vmem:[#allocation3 + $0x30] sm:$0xff] }
  0x26   :  { %v223_v54 = vand.u32 4294901760, %v222_v44  ;;  %116 = vmatprep.subr.mxu0 %v2446_v18  ;;  %212 = vmatprep.subr.mxu1 %v211_v48  ;;  %v229_v58 = vand.u32 4294901760, %v228_v49  ;;  %v240_v59 = vsub.f32 %v2504_v41, %v4038_v50  ;;  %v2544_v60 = vsub.f32 %v79_v14, %v2444_v17 }
  0x27   :  { %4334 = vst [vmem:[#allocation12_spill] sm:$0xff] %v2528_v51  ;;  %v2547_v61 = vand.u32 4294901760, %v2520_v47  ;;  %118 = vmatpush1.msra.mxu0 %v2459_v23  ;;  %218 = vmatpush1.msra.mxu1 %v217_v53  ;;  %v235_v63 = vand.u32 4294901760, %v234_v55  ;;  %v246_v1 = vsub.f32 %v2518_v46, %v4036_v56  ;;  %v2556_v2 = vsub.f32 %v78_v15, %v2446_v18  ;;  %v2572_v15 = vld [vmem:[#allocation3 + $0x50] sm:$0xff] }
  0x28   :  { %v2559_v3 = vand.u32 4294901760, %v2530_v52  ;;  %120 = vmatprep.subr.mxu0 %v2465_v25  ;;  %224 = vmatprep.subr.mxu1 %v223_v54  ;;  %v241_v8 = vand.u32 4294901760, %v240_v59  ;;  %v4035_v9 = vand.u32 4294901760, %v2544_v60  ;;  %v2567_v13 = vsub.f32 %v2451_v20, %v2459_v23 }
  0x29   :  { %4335 = vst [vmem:[#allocation13_spill] sm:$0xff] %v2547_v61  ;;  %v2570_v14 = vand.u32 4294901760, %v2537_v57  ;;  %122 = vmatpush1.msra.mxu0 %v2479_v31  ;;  %230 = vmatpush1.msra.mxu1 %v229_v58  ;;  %v247_v39 = vand.u32 4294901760, %v246_v1  ;;  %v4034_v43 = vand.u32 4294901760, %v2556_v2  ;;  %v2578_v44 = vsub.f32 %v2453_v21, %v2465_v25  ;;  %v2595_v21 = vld [vmem:[#allocation3 + $0x48] sm:$0xff] }
  0x2a   :  { %4336 = vst [vmem:[#allocation14_spill] sm:$0xff] %v2559_v3  ;;  %v2581_v48 = vand.u32 4294901760, %v2549_v62  ;;  %124 = vmatprep.subr.mxu0 %v2485_v33  ;;  %236 = vmatprep.subr.mxu1 %v235_v63  ;;  %v252_v20 = vsub.f32 %v2544_v60, %v4035_v9  ;;  %v4037_v49 = vand.u32 4294901760, %v2567_v13  ;;  %v2590_v53 = vsub.f32 %v2455_v22, %v2479_v31  ;;  %v2618_v9 = vld [vmem:[#allocation3 + $0x40] sm:$0xff] }
  0x2b   :  { %4337 = vst [vmem:[#allocation15_spill] sm:$0xff] %v2570_v14  ;;  %v2593_v54 = vand.u32 4294901760, %v2561_v7  ;;  %126 = vmatpush1.msra.mxu0 %v2494_v37  ;;  %242 = vmatpush1.msra.mxu1 %v241_v8  ;;  %v258_v55 = vsub.f32 %v2556_v2, %v4034_v43  ;;  %v4039_v58 = vand.u32 4294901760, %v2578_v44  ;;  %v2604_v59 = vsub.f32 %v2470_v27, %v2485_v33 }
  0x2c   :  { %4338 = vst [vmem:[#allocation16_spill] sm:$0xff] %v2581_v48  ;;  %v2607_v22 = vand.u32 4294901760, %v2572_v15  ;;  %128 = vmatprep.subr.mxu0 %v2507_v42  ;;  %248 = vmatprep.subr.mxu1 %v247_v39  ;;  %v253_v63 = vand.u32 4294901760, %v252_v20  ;;  %v264_v1 = vsub.f32 %v2567_v13, %v4037_v49  ;;  %v4042_v8 = vand.u32 4294901760, %v2590_v53  ;;  %v2628_v49 = vld [vmem:[#allocation3 + $0x38] sm:$0xff] }
  0x2d   :  { %4339 = vst [vmem:[#allocation17_spill] sm:$0xff] %v2593_v54  ;;  %v2616_v43 = vsub.f32 %v2472_v28, %v2494_v37  ;;  %130 = vmatpush1.msra.mxu0 %v2528_v51  ;;  %v259_v27 = vand.u32 4294901760, %v258_v55  ;;  %v270_v39 = vsub.f32 %v2578_v44, %v4039_v58  ;;  %v4044_v20 = vand.u32 4294901760, %v2604_v59 }
  0x2e   :  { %4340 = vst [vmem:[#allocation18_spill] sm:$0xff] %v2607_v22  ;;  %v2626_v56 = vand.u32 4294901760, %v2595_v21  ;;  %254 = vmatpush1.msra.mxu1 %v253_v63  ;;  %132 = vmatprep.subr.mxu0 %v2547_v61  ;;  %v265_v28 = vand.u32 4294901760, %v264_v1  ;;  %v276_v50 = vsub.f32 %v2590_v53, %v4042_v8  ;;  %v2637_v58 = vsub.f32 %v2474_v29, %v2507_v42 }
  0x2f   :  { %v4047_v55 = vand.u32 4294901760, %v2616_v43  ;;  %260 = vmatprep.subr.mxu1 %v259_v27  ;;  %134 = vmatpush1.msra.mxu0 %v2559_v3  ;;  %v271_v40 = vand.u32 4294901760, %v270_v39  ;;  %v282_v63 = vsub.f32 %v2604_v59, %v4044_v20  ;;  %v2646_v1 = vand.u32 4294901760, %v2618_v9 }
  0x30   :  { %4341 = vst [vmem:[#allocation19_spill] sm:$0xff] %v2626_v56  ;;  %v2650_v8 = vsub.f32 %v2496_v38, %v2528_v51  ;;  %266 = vmatpush1.msra.mxu1 %v265_v28  ;;  %136 = vmatprep.subr.mxu0 %v2570_v14  ;;  %v277_v29 = vand.u32 4294901760, %v276_v50  ;;  %v4052_v39 = vand.u32 4294901760, %v2637_v58  ;;  %v2660_v20 = vand.u32 4294901760, %v2628_v49 }
  0x31   :  { %4342 = vst [vmem:[#allocation20_spill] sm:$0xff] %v2646_v1  ;;  %v288_v27 = vsub.f32 %v2616_v43, %v4047_v55  ;;  %272 = vmatprep.subr.mxu1 %v271_v40  ;;  %138 = vmatpush1.msra.mxu0 %v2581_v48  ;;  %v283_v38 = vand.u32 4294901760, %v282_v63  ;;  %v2668_v50 = vsub.f32 %v2520_v47, %v2547_v61  ;;  %v2671_v30 = vand.u32 4294901760, %v2639_v45  ;;  %v2673_v55 = vld [vmem:[#allocation3 + $0x18] sm:$0xff] }
  0x32   :  { %v4055_v28 = vand.u32 4294901760, %v2650_v8  ;;  %278 = vmatpush1.msra.mxu1 %v277_v29  ;;  %140 = vmatprep.subr.mxu0 %v2593_v54  ;;  %v294_v40 = vsub.f32 %v2637_v58, %v4052_v39  ;;  %v2681_v63 = vsub.f32 %v2530_v52, %v2559_v3  ;;  %v2684_v47 = vand.u32 4294901760, %v2652_v35  ;;  %v2698_v52 = vld [vmem:[#allocation3 + $0x10] sm:$0xff] }
  0x33   :  { %4343 = vst [vmem:[#allocation21_spill] sm:$0xff] %v2671_v30  ;;  %v289_v0 = vand.u32 4294901760, %v288_v27  ;;  %284 = vmatprep.subr.mxu1 %v283_v38  ;;  %142 = vmatpush1.msra.mxu0 %v2607_v22  ;;  %v2693_v61 = vsub.f32 %v2537_v57, %v2570_v14  ;;  %v2696_v39 = vand.u32 4294901760, %v2662_v34  ;;  %v2707_v27 = vand.u32 4294901760, %v2673_v55  ;;  %v2709_v57 = vld [vmem:[#allocation3 + $0x8] sm:$0xff] }
  0x34   :  { %4344 = vst [vmem:[#allocation22_spill] sm:$0xff] %v2684_v47  ;;  %v300_v29 = vsub.f32 %v2650_v8, %v4055_v28  ;;  %144 = vmatprep.subr.mxu0 %v2626_v56  ;;  %v295_v38 = vand.u32 4294901760, %v294_v40  ;;  %v2704_v28 = vsub.f32 %v2549_v62, %v2581_v48  ;;  %v4346_v51 = vand.u32 4294901760, %v2668_v50  ;;  %v2732_v40 = vld [vmem:[#allocation3] sm:$0xff] }
  0x35   :  { %4345 = vst [vmem:[#allocation23_spill] sm:$0xff] %v2696_v39  ;;  %290 = vmatpush1.msra.mxu1 %v289_v0  ;;  %146 = vmatpush1.msra.mxu0 %v2646_v1  ;;  %v2718_v3 = vsub.f32 %v2561_v7, %v2593_v54  ;;  %v4348_v62 = vand.u32 4294901760, %v2681_v63  ;;  %v2740_v42 = vand.u32 4294901760, %v2709_v57 }
  0x36   :  { %v301_v14 = vand.u32 4294901760, %v300_v29  ;;  %v306_v0 = vsub.f32 %v2668_v50, %v4346_v51  ;;  %296 = vmatprep.subr.mxu1 %v295_v38  ;;  %148 = vmatprep.subr.mxu0 %v2660_v20  ;;  %v2726_v29 = vand.u32 4294901760, %v2698_v52  ;;  %v2730_v51 = vsub.f32 %v2572_v15, %v2607_v22 }
  0x37   :  { %4347 = vst [vmem:[#allocation24_spill] sm:$0xff] %v2718_v3  ;;  %v312_v48 = vsub.f32 %v2681_v63, %v4348_v62  ;;  %150 = vmatpush1.msra.mxu0 %v2671_v30  ;;  %v4350_v38 = vand.u32 4294901760, %v2693_v61  ;;  %v4351_v15 = vand.u32 4294901760, %v2704_v28 }
  0x38   :  { %4349 = vst [vmem:[#allocation25_spill] sm:$0xff] %v2726_v29  ;;  %302 = vmatpush1.msra.mxu1 %v301_v14  ;;  %v307_v7 = vand.u32 4294901760, %v306_v0  ;;  %152 = vmatprep.subr.mxu0 %v2684_v47  ;;  %v2749_v0 = vsub.f32 %v2595_v21, %v2626_v56  ;;  %v2763_v14 = vsub.f32 %v2618_v9, %v2646_v1 }
  0x39   :  { %v318_v54 = vsub.f32 %v2693_v61, %v4350_v38  ;;  %v313_v37 = vand.u32 4294901760, %v312_v48  ;;  %v324_v22 = vsub.f32 %v2704_v28, %v4351_v15  ;;  %v54_v38 = vld [vmem:[%s4028_s0] sm:$0xff]  ;;  %154 = vmatpush1.msra.mxu0 %v2696_v39  ;;  %v4352_v48 = vand.u32 4294901760, %v2718_v3 }
  0x3a   :  { %308 = vmatprep.subr.mxu1 %v307_v7  ;;  %v2759_v15 = vand.u32 4294901760, %v2732_v40  ;;  %156 = vmatprep.subr.mxu0 %v2707_v27  ;;  %v4353_v7 = vand.u32 4294901760, %v2730_v51  ;;  %v4076_v56 = vand.u32 4294901760, %v2749_v0  ;;  %v4079_v9 = vand.u32 4294901760, %v2763_v14 }
  0x3b   :  { %v319_v62 = vand.u32 4294901760, %v318_v54  ;;  %v330_v33 = vsub.f32 %v2718_v3, %v4352_v48  ;;  %314 = vmatpush1.msra.mxu1 %v313_v37  ;;  %v325_v21 = vand.u32 4294901760, %v324_v22  ;;  %v2772_v48 = vsub.f32 %v2628_v49, %v2660_v20  ;;  %158 = vmatpush1.msra.mxu0 %v2726_v29 }
  0x3c   :  { %v336_v54 = vsub.f32 %v2730_v51, %v4353_v7  ;;  %v2776_v37 = vand.u32 4294901760, %v54_v38  ;;  %v2780_v22 = vsub.f32 %v2639_v45, %v2671_v30  ;;  %160 = vmatprep.subr.mxu0 %v2740_v42  ;;  %v342_v49 = vsub.f32 %v2749_v0, %v4076_v56 }
  0x3d   :  { %320 = vmatprep.subr.mxu1 %v319_v62  ;;  %v331_v3 = vand.u32 4294901760, %v330_v33  ;;  %v2789_v62 = vsub.f32 %v2652_v35, %v2684_v47  ;;  %162 = vmatpush1.msra.mxu0 %v2759_v15  ;;  %v348_v45 = vsub.f32 %v2763_v14, %v4079_v9  ;;  %v2801_v56 = vsub.f32 %v2662_v34, %v2696_v39 }
  0x3e   :  { %4354 = vst [vmem:[#allocation26_spill] sm:$0xff] %v2776_v37  ;;  %326 = vmatpush1.msra.mxu1 %v325_v21  ;;  %v337_v7 = vand.u32 4294901760, %v336_v54  ;;  %v2796_v21 = vsub.f32 %v54_v38, %v2776_v37  ;;  %v343_v33 = vand.u32 4294901760, %v342_v49  ;;  %v4355_v35 = vand.u32 4294901760, %v2772_v48  ;;  %441 = vmatprep.subr.mxu0 %v2449_v19 }
  0x3f   :  { %332 = vmatprep.subr.mxu1 %v331_v3  ;;  %v4084_v47 = vand.u32 4294901760, %v2789_v62  ;;  %v2810_v38 = vsub.f32 %v2673_v55, %v2707_v27  ;;  %v349_v9 = vand.u32 4294901760, %v348_v45  ;;  %v4356_v34 = vand.u32 4294901760, %v2780_v22 }
  0x40   :  { %338 = vmatpush1.msra.mxu1 %v337_v7  ;;  %v354_v3 = vsub.f32 %v2772_v48, %v4355_v35  ;;  %v4085_v54 = vand.u32 4294901760, %v2796_v21  ;;  %v4088_v49 = vand.u32 4294901760, %v2801_v56  ;;  %v2823_v55 = vsub.f32 %v2698_v52, %v2726_v29 }
  0x41   :  { %v360_v7 = vsub.f32 %v2780_v22, %v4356_v34  ;;  %344 = vmatprep.subr.mxu1 %v343_v33  ;;  %v366_v35 = vsub.f32 %v2789_v62, %v4084_v47  ;;  %v4092_v30 = vand.u32 4294901760, %v2810_v38 }
  0x42   :  { %v355_v39 = vand.u32 4294901760, %v354_v3  ;;  %4357 = vst [vmem:[#allocation27_spill] sm:$0xff] %v2823_v55  ;;  %350 = vmatpush1.msra.mxu1 %v349_v9  ;;  %v199_v45 = vsub.f32 %v2796_v21, %v4085_v54  ;;  %v372_v33 = vsub.f32 %v2801_v56, %v4088_v49  ;;  %v2833_v3 = vsub.f32 %v2709_v57, %v2740_v42 }
  0x43   :  { %v361_v34 = vand.u32 4294901760, %v360_v7  ;;  %v367_v47 = vand.u32 4294901760, %v366_v35  ;;  %v378_v52 = vsub.f32 %v2810_v38, %v4092_v30  ;;  %v4091_v9 = vand.u32 4294901760, %v2823_v55 }
  0x44   :  { %356 = vmatprep.subr.mxu1 %v355_v39  ;;  %v2841_v54 = vsub.f32 %v2732_v40, %v2759_v15  ;;  %v200_v7 = vand.u32 4294901760, %v199_v45  ;;  %v373_v29 = vand.u32 4294901760, %v372_v33  ;;  %v4090_v49 = vand.u32 4294901760, %v2833_v3 }
  0x45   :  { %362 = vmatpush1.msra.mxu1 %v361_v34  ;;  %v379_v57 = vand.u32 4294901760, %v378_v52  ;;  %v384_v39 = vsub.f32 %v2823_v55, %v4091_v9  ;;  %v4359_v33 = vmov 0.0   ;;  %v4360_v52 = vld [vmem:[#allocation9_spill] sm:$0xff]  ;;  %v4371_v9 = vld [vmem:[#allocation19_spill] sm:$0xff]  ;;  %v4372_v30 = vand.u32 4294901760, %v2449_v19 }
  0x46   :  { %4358 = vst [vmem:[#allocation28_spill] sm:$0xff] %v2841_v54  ;;  %368 = vmatprep.subr.mxu1 %v367_v47  ;;  %v4089_v35 = vand.u32 4294901760, %v2841_v54  ;;  %201 = vmatmul.mubr.f32.vlgmr.msra.gmra.mxu0 %v200_v7  ;;  %v390_v40 = vsub.f32 %v2833_v3, %v4090_v49  ;;  %v4361_v7 = vld [vmem:[#allocation24_spill] sm:$0xff]  ;;  %v4370_v49 = vld [vmem:[#allocation18_spill] sm:$0xff]  ;;  %v4379_v19 = vand.u32 4294901760, %v2491_v36 }
  0x47   :  { %374 = vmatpush1.msra.mxu1 %v373_v29  ;;  %444 = vmatpush1.msra.mxu0 %v2462_v24  ;;  %v385_v45 = vand.u32 4294901760, %v384_v39  ;;  %v4363_v39 = vld [vmem:[#allocation11_spill] sm:$0xff] }
  0x48   :  { %380 = vmatprep.subr.mxu1 %v379_v57  ;;  %v396_v47 = vsub.f32 %v2841_v54, %v4089_v35  ;;  %447 = vmatprep.subr.mxu0 %v2468_v26  ;;  %v391_v34 = vand.u32 4294901760, %v390_v40  ;;  %v4362_v57 = vld [vmem:[#allocation10_spill] sm:$0xff]  ;;  %v4364_v40 = vld [vmem:[#allocation12_spill] sm:$0xff]  ;;  %v4369_v35 = vld [vmem:[#allocation17_spill] sm:$0xff] }
  0x49   :  { %567 = vmatprep.mubr.f32.mxu0 %v4359_v33  ;;  %450 = vmatpush1.msra.mxu0 %v2482_v32 }
  0x4a   :  { %386 = vmatpush1.msra.mxu1 %v385_v45  ;;  %v397_v29 = vand.u32 4294901760, %v396_v47  ;;  %453 = vmatprep.subr.mxu0 %v2491_v36  ;;  %v4365_v45 = vld [vmem:[#allocation13_spill] sm:$0xff]  ;;  %v4366_v47 = vld [vmem:[#allocation14_spill] sm:$0xff]  ;;  %v4384_v36 = vand.u32 4294901760, %v2796_v21 }
  0x4b   :  { %392 = vmatprep.subr.mxu1 %v391_v34  ;;  %456 = vmatpush1.msra.mxu0 %v2504_v41  ;;  %v4367_v34 = vld [vmem:[#allocation15_spill] sm:$0xff] }
  0x4c   :  { %398 = vmatpush1.msra.mxu1 %v397_v29  ;;  %459 = vmatprep.subr.mxu0 %v2518_v46  ;;  %v4368_v29 = vld [vmem:[#allocation16_spill] sm:$0xff] }
  0x4d   :  { %433 = vmatmul.mubr.f32.vlgmr.msra.gmra.mxu1 %v2776_v37  ;;  %462 = vmatpush1.msra.mxu0 %v2544_v60  ;;  %v4373_v37 = vld [vmem:[#allocation21_spill] sm:$0xff] }
  0x4e   :  { %577 = vmatprep.subr.mxu1 %v2429_v4  ;;  %465 = vmatprep.subr.mxu0 %v2556_v2 }
  0x4f   :  { %579 = vmatpush1.msra.mxu1 %v2431_v5  ;;  %468 = vmatpush1.msra.mxu0 %v2567_v13 }
  0x50   :  { %581 = vmatprep.subr.mxu1 %v2433_v6  ;;  %471 = vmatprep.subr.mxu0 %v2578_v44 }
  0x51   :  { %583 = vmatpush1.msra.mxu1 %v2435_v10  ;;  %474 = vmatpush1.msra.mxu0 %v2590_v53 }
  0x52   :  { %585 = vmatprep.subr.mxu1 %v2437_v11  ;;  %477 = vmatprep.subr.mxu0 %v2604_v59 }
  0x53   :  { %587 = vmatpush1.msra.mxu1 %v2439_v12  ;;  %480 = vmatpush1.msra.mxu0 %v2616_v43 }
  0x54   :  { %589 = vmatprep.subr.mxu1 %v2442_v16  ;;  %483 = vmatprep.subr.mxu0 %v2637_v58 }
  0x55   :  { %591 = vmatpush1.msra.mxu1 %v2444_v17  ;;  %486 = vmatpush1.msra.mxu0 %v2650_v8 }
  0x56   :  { %593 = vmatprep.subr.mxu1 %v2446_v18  ;;  %489 = vmatprep.subr.mxu0 %v2668_v50 }
  0x57   :  { %595 = vmatpush1.msra.mxu1 %v2459_v23  ;;  %492 = vmatpush1.msra.mxu0 %v2681_v63 }
  0x58   :  { %597 = vmatprep.subr.mxu1 %v2465_v25  ;;  %495 = vmatprep.subr.mxu0 %v2693_v61 }
  0x59   :  { %599 = vmatpush1.msra.mxu1 %v2479_v31  ;;  %498 = vmatpush1.msra.mxu0 %v2704_v28 }
  0x5a   :  { %601 = vmatprep.subr.mxu1 %v4360_v52  ;;  %501 = vmatprep.subr.mxu0 %v4361_v7 }
  0x5b   :  { %603 = vmatpush1.msra.mxu1 %v4362_v57  ;;  %504 = vmatpush1.msra.mxu0 %v2730_v51 }
  0x5c   :  { %605 = vmatprep.subr.mxu1 %v4363_v39  ;;  %507 = vmatprep.subr.mxu0 %v2749_v0 }
  0x5d   :  { %607 = vmatpush1.msra.mxu1 %v4364_v40  ;;  %510 = vmatpush1.msra.mxu0 %v2763_v14 }
  0x5e   :  { %609 = vmatprep.subr.mxu1 %v4365_v45  ;;  %513 = vmatprep.subr.mxu0 %v2772_v48 }
  0x5f   :  { %611 = vmatpush1.msra.mxu1 %v4366_v47  ;;  %516 = vmatpush1.msra.mxu0 %v2780_v22 }
  0x60   :  { %613 = vmatprep.subr.mxu1 %v4367_v34  ;;  %519 = vmatprep.subr.mxu0 %v2789_v62 }
  0x61   :  { %615 = vmatpush1.msra.mxu1 %v4368_v29  ;;  %522 = vmatpush1.msra.mxu0 %v2801_v56 }
  0x62   :  { %617 = vmatprep.subr.mxu1 %v4369_v35  ;;  %525 = vmatprep.subr.mxu0 %v2810_v38 }
  0x63   :  { %619 = vmatpush1.msra.mxu1 %v4370_v49  ;;  %528 = vmatpush1.msra.mxu0 %v2823_v55  ;;  %v4374_v49 = vand.u32 4294901760, %v2462_v24  ;;  %v4375_v55 = vld [vmem:[#allocation22_spill] sm:$0xff]  ;;  %v4381_v24 = vand.u32 4294901760, %v2504_v41  ;;  %v4386_v41 = vand.u32 4294901760, %v2567_v13  ;;  %v4403_v13 = vand.u32 4294901760, %v2789_v62 }
  0x64   :  { %621 = vmatprep.subr.mxu1 %v4371_v9  ;;  %531 = vmatprep.subr.mxu0 %v2833_v3  ;;  %v4376_v9 = vand.u32 4294901760, %v2468_v26  ;;  %v4382_v26 = vand.u32 4294901760, %v2518_v46  ;;  %v4387_v46 = vand.u32 4294901760, %v2578_v44  ;;  %v4405_v44 = vand.u32 4294901760, %v2810_v38  ;;  %v983_v38 = vld [vmem:[#allocation5 + $0xc8] sm:$0xff] }
  0x65   :  { %623 = vmatpush1.msra.mxu1 %v2646_v1  ;;  %534 = vmatpush1.msra.mxu0 %v2841_v54  ;;  %v4377_v1 = vld [vmem:[#allocation23_spill] sm:$0xff]  ;;  %v4378_v54 = vand.u32 4294901760, %v2482_v32  ;;  %v4383_v32 = vand.u32 4294901760, %v2544_v60  ;;  %v4388_v60 = vand.u32 4294901760, %v2590_v53 }
  0x66   :  { %625 = vmatprep.subr.mxu1 %v2660_v20  ;;  %570 = vmatmul.mubr.f32.vlgmr.msra.gmra.mxu0 %v2796_v21  ;;  %v4406_v53 = vld [vmem:[#allocation27_spill] sm:$0xff] }
  0x67   :  { %685 = vmatprep.subr.mxu0 %v4372_v30  ;;  %627 = vmatpush1.msra.mxu1 %v4373_v37  ;;  %v4380_v30 = vld [vmem:[#allocation25_spill] sm:$0xff]  ;;  %v984_v21 = vld [vmem:[#allocation5 + $0xd0] sm:$0xff] }
  0x68   :  { %689 = vmatpush1.msra.mxu0 %v4374_v49  ;;  %629 = vmatprep.subr.mxu1 %v4375_v55  ;;  %v3036_v49 = vand.u32 4294901760, %v984_v21 }
  0x69   :  { %693 = vmatprep.subr.mxu0 %v4376_v9  ;;  %631 = vmatpush1.msra.mxu1 %v4377_v1 }
  0x6a   :  { %697 = vmatpush1.msra.mxu0 %v4378_v54  ;;  %633 = vmatprep.subr.mxu1 %v2707_v27  ;;  %v4385_v54 = vand.u32 4294901760, %v2556_v2  ;;  %v4389_v2 = vand.u32 4294901760, %v2604_v59  ;;  %v4408_v59 = vld [vmem:[#allocation18_spill] sm:$0xff] }
  0x6b   :  { %701 = vmatprep.subr.mxu0 %v4379_v19  ;;  %635 = vmatpush1.msra.mxu1 %v4380_v30 }
  0x6c   :  { %705 = vmatpush1.msra.mxu0 %v4381_v24  ;;  %637 = vmatprep.subr.mxu1 %v2740_v42 }
  0x6d   :  { %709 = vmatprep.subr.mxu0 %v4382_v26  ;;  %639 = vmatpush1.msra.mxu1 %v2759_v15 }
  0x6e   :  { %672 = vmatprep.mubr.f32.mxu1 %v4359_v33  ;;  %713 = vmatpush1.msra.mxu0 %v4383_v32 }
  0x6f   :  { %676 = vmatmul.mubr.f32.vlgmr.msra.gmra.mxu1 %v4384_v36  ;;  %717 = vmatprep.subr.mxu0 %v4385_v54 }
  0x70   :  { %851 = vmatprep.subr.mxu1 %v2429_v4  ;;  %721 = vmatpush1.msra.mxu0 %v4386_v41  ;;  %v4390_v4 = vand.u32 4294901760, %v2616_v43  ;;  %v4404_v43 = vand.u32 4294901760, %v2801_v56 }
  0x71   :  { %853 = vmatpush1.msra.mxu1 %v2431_v5  ;;  %725 = vmatprep.subr.mxu0 %v4387_v46  ;;  %v4391_v5 = vand.u32 4294901760, %v2637_v58  ;;  %v4407_v58 = vand.u32 4294901760, %v4406_v53  ;;  %v981_v46 = vld [vmem:[#allocation5 + $0xb8] sm:$0xff] }
  0x72   :  { %855 = vmatprep.subr.mxu1 %v2433_v6  ;;  %729 = vmatpush1.msra.mxu0 %v4388_v60  ;;  %v4392_v6 = vand.u32 4294901760, %v2650_v8  ;;  %v4409_v8 = vand.u32 4294901760, %v2833_v3  ;;  %v982_v3 = vld [vmem:[#allocation5 + $0xc0] sm:$0xff] }
  0x73   :  { %857 = vmatpush1.msra.mxu1 %v2435_v10  ;;  %733 = vmatprep.subr.mxu0 %v4389_v2  ;;  %v4393_v10 = vand.u32 4294901760, %v2668_v50  ;;  %v4411_v50 = vld [vmem:[#allocation28_spill] sm:$0xff] }
  0x74   :  { %859 = vmatprep.subr.mxu1 %v2437_v11  ;;  %737 = vmatpush1.msra.mxu0 %v4390_v4  ;;  %v4394_v11 = vand.u32 4294901760, %v2681_v63  ;;  %v4412_v56 = vand.u32 4294901760, %v4411_v50  ;;  %v4413_v63 = vld [vmem:[#allocation20_spill] sm:$0xff] }
  0x75   :  { %861 = vmatpush1.msra.mxu1 %v2439_v12  ;;  %741 = vmatprep.subr.mxu0 %v4391_v5  ;;  %v4395_v12 = vand.u32 4294901760, %v2693_v61  ;;  %v4402_v61 = vand.u32 4294901760, %v2780_v22  ;;  %v986_v22 = vld [vmem:[#allocation5 + $0xe0] sm:$0xff] }
  0x76   :  { %863 = vmatprep.subr.mxu1 %v2442_v16  ;;  %745 = vmatpush1.msra.mxu0 %v4392_v6  ;;  %v4396_v16 = vand.u32 4294901760, %v2704_v28  ;;  %v4410_v28 = vld [vmem:[#allocation19_spill] sm:$0xff] }
  0x77   :  { %865 = vmatpush1.msra.mxu1 %v2444_v17  ;;  %749 = vmatprep.subr.mxu0 %v4393_v10  ;;  %v4397_v17 = vand.u32 4294901760, %v4361_v7  ;;  %v980_v6 = vld [vmem:[#allocation5 + $0xb0] sm:$0xff]  ;;  %v979_v10 = vld [vmem:[#allocation5 + $0xa8] sm:$0xff] }
  0x78   :  { %867 = vmatprep.subr.mxu1 %v2446_v18  ;;  %753 = vmatpush1.msra.mxu0 %v4394_v11  ;;  %v4398_v18 = vand.u32 4294901760, %v2730_v51  ;;  %v4414_v51 = vld [vmem:[#allocation26_spill] sm:$0xff]  ;;  %v978_v11 = vld [vmem:[#allocation5 + $0xa0] sm:$0xff]  ;;  %v3105_v53 = vand.u32 4294901760, %v980_v6 }
  0x79   :  { %869 = vmatpush1.msra.mxu1 %v2459_v23  ;;  %757 = vmatprep.subr.mxu0 %v4395_v12  ;;  %v4399_v23 = vand.u32 4294901760, %v2749_v0 }
  0x7a   :  { %871 = vmatprep.subr.mxu1 %v2465_v25  ;;  %761 = vmatpush1.msra.mxu0 %v4396_v16  ;;  %v4400_v25 = vand.u32 4294901760, %v2763_v14  ;;  %v989_v14 = vld [vmem:[#allocation5 + $0xf8] sm:$0xff] }
  0x7b   :  { %873 = vmatpush1.msra.mxu1 %v2479_v31  ;;  %765 = vmatprep.subr.mxu0 %v4397_v17  ;;  %v4401_v31 = vand.u32 4294901760, %v2772_v48  ;;  %v3022_v0 = vand.u32 4294901760, %v989_v14  ;;  %v987_v48 = vld [vmem:[#allocation5 + $0xe8] sm:$0xff] }
  0x7c   :  { %875 = vmatprep.subr.mxu1 %v4360_v52  ;;  %769 = vmatpush1.msra.mxu0 %v4398_v18  ;;  %v3027_v62 = vand.u32 4294901760, %v987_v48  ;;  %v3050_v52 = vand.u32 4294901760, %v982_v3 }
  0x7d   :  { %877 = vmatpush1.msra.mxu1 %v4362_v57  ;;  %773 = vmatprep.subr.mxu0 %v4399_v23  ;;  %4415 = vst [vmem:[#allocation9_spill] sm:$0xff] %v3022_v0  ;;  %v977_v23 = vld [vmem:[#allocation5 + $0x98] sm:$0xff] }
  0x7e   :  { %879 = vmatprep.subr.mxu1 %v4363_v39  ;;  %777 = vmatpush1.msra.mxu0 %v4400_v25  ;;  %v3058_v39 = vsub.f32 %v984_v21, %v3036_v49  ;;  %v976_v25 = vld [vmem:[#allocation5 + $0x90] sm:$0xff] }
  0x7f   :  { %881 = vmatpush1.msra.mxu1 %v4364_v40  ;;  %781 = vmatprep.subr.mxu0 %v4401_v31  ;;  %v975_v31 = vld [vmem:[#allocation5 + $0x88] sm:$0xff]  ;;  %v3116_v50 = vand.u32 4294901760, %v976_v25 }
  0x80   :  { %883 = vmatprep.subr.mxu1 %v4365_v45  ;;  %785 = vmatpush1.msra.mxu0 %v4402_v61  ;;  %v4108_v24 = vand.u32 4294901760, %v3058_v39 }
  0x81   :  { %885 = vmatpush1.msra.mxu1 %v4366_v47  ;;  %789 = vmatprep.subr.mxu0 %v4403_v13 }
  0x82   :  { %887 = vmatprep.subr.mxu1 %v4367_v34  ;;  %793 = vmatpush1.msra.mxu0 %v4404_v43  ;;  %v1200_v4 = vsub.f32 %v3058_v39, %v4108_v24  ;;  %v3103_v43 = vand.u32 4294901760, %v981_v46 }
  0x83   :  { %889 = vmatpush1.msra.mxu1 %v4368_v29  ;;  %797 = vmatprep.subr.mxu0 %v4405_v44  ;;  %v3068_v29 = vsub.f32 %v982_v3, %v3050_v52 }
  0x84   :  { %891 = vmatprep.subr.mxu1 %v4369_v35  ;;  %801 = vmatpush1.msra.mxu0 %v4407_v58  ;;  %v3045_v35 = vsub.f32 %v987_v48, %v3027_v62  ;;  %v1201_v13 = vand.u32 4294901760, %v1200_v4  ;;  %v3107_v58 = vand.u32 4294901760, %v979_v10 }
  0x85   :  { %893 = vmatpush1.msra.mxu1 %v4408_v59  ;;  %805 = vmatprep.subr.mxu0 %v4409_v8  ;;  %v4106_v41 = vand.u32 4294901760, %v3068_v29  ;;  %v3109_v59 = vand.u32 4294901760, %v978_v11  ;;  %v3112_v8 = vsub.f32 %v981_v46, %v3103_v43 }
  0x86   :  { %895 = vmatprep.subr.mxu1 %v4410_v28  ;;  %809 = vmatpush1.msra.mxu0 %v4412_v56  ;;  %v4112_v47 = vand.u32 4294901760, %v3045_v35  ;;  %v3114_v28 = vand.u32 4294901760, %v977_v23  ;;  %v3118_v56 = vand.u32 4294901760, %v975_v31 }
  0x87   :  { %842 = vmatprep.mubr.f32.mxu0 %v4359_v33  ;;  %897 = vmatpush1.msra.mxu1 %v4413_v63  ;;  %v1212_v18 = vsub.f32 %v3068_v29, %v4106_v41  ;;  %v4105_v48 = vand.u32 4294901760, %v3112_v8 }
  0x88   :  { %844 = vmatmul.mubr.f32.vlgmr.msra.gmra.mxu0 %v4414_v51  ;;  %899 = vmatprep.subr.mxu1 %v2660_v20  ;;  %v988_v20 = vld [vmem:[#allocation5 + $0xf0] sm:$0xff]  ;;  %v1182_v36 = vsub.f32 %v3045_v35, %v4112_v47  ;;  %v3139_v21 = vsub.f32 %v975_v31, %v3118_v56  ;;  %v970_v31 = vld [vmem:[#allocation5 + $0x60] sm:$0xff] }
  0x89   :  { %946 = vmatprep.mubr.f32.mxu1 %v4359_v33  ;;  %901 = vmatpush1.msra.mxu1 %v4373_v37  ;;  %v3025_v37 = vand.u32 4294901760, %v988_v20  ;;  %v1213_v63 = vand.u32 4294901760, %v1212_v18  ;;  %v964_v47 = vld [vmem:[#allocation5 + $0x30] sm:$0xff] }
  0x8a   :  { %903 = vmatprep.subr.mxu1 %v4375_v55  ;;  %v3038_v55 = vand.u32 4294901760, %v983_v38  ;;  %1023 = vmatprep.subr.mxu0 %v3022_v0  ;;  %v1183_v16 = vand.u32 4294901760, %v1182_v36  ;;  %4417 = vst [vmem:[#allocation10_spill] sm:$0xff] %v3139_v21 }
  0x8b   :  { %905 = vmatpush1.msra.mxu1 %v4377_v1  ;;  %v3029_v1 = vand.u32 4294901760, %v986_v22  ;;  %v3042_v9 = vsub.f32 %v988_v20, %v3025_v37  ;;  %1025 = vmatpush1.msra.mxu0 %v3025_v37  ;;  %v3128_v20 = vsub.f32 %v978_v11, %v3109_v59  ;;  %v973_v11 = vld [vmem:[#allocation5 + $0x78] sm:$0xff] }
  0x8c   :  { %907 = vmatprep.subr.mxu1 %v2707_v27  ;;  %v985_v27 = vld [vmem:[#allocation5 + $0xd8] sm:$0xff]  ;;  %v3061_v40 = vsub.f32 %v983_v38, %v3038_v55  ;;  %1027 = vmatprep.subr.mxu0 %v3027_v62  ;;  %v974_v38 = vld [vmem:[#allocation5 + $0x80] sm:$0xff] }
  0x8d   :  { %909 = vmatpush1.msra.mxu1 %v4380_v30  ;;  %v3048_v33 = vsub.f32 %v986_v22, %v3029_v1  ;;  %v4113_v45 = vand.u32 4294901760, %v3042_v9  ;;  %1029 = vmatpush1.msra.mxu0 %v3029_v1  ;;  %v3133_v22 = vsub.f32 %v977_v23, %v3114_v28  ;;  %v3145_v36 = vand.u32 4294901760, %v974_v38  ;;  %v972_v23 = vld [vmem:[#allocation5 + $0x70] sm:$0xff] }
  0x8e   :  { %911 = vmatprep.subr.mxu1 %v2740_v42  ;;  %v3032_v42 = vsub.f32 %v989_v14, %v3022_v0  ;;  %v4107_v26 = vand.u32 4294901760, %v3061_v40  ;;  %v3125_v14 = vsub.f32 %v979_v10, %v3107_v58 }
  0x8f   :  { %913 = vmatpush1.msra.mxu1 %v2759_v15  ;;  %v3034_v15 = vand.u32 4294901760, %v985_v27  ;;  %v4111_v34 = vand.u32 4294901760, %v3048_v33  ;;  %v1176_v32 = vsub.f32 %v3042_v9, %v4113_v45  ;;  %v4099_v46 = vand.u32 4294901760, %v3133_v22 }
  0x90   :  { %948 = vmatmul.mubr.f32.vlgmr.msra.gmra.mxu1 %v4414_v51  ;;  %4416 = vst [vmem:[#allocation24_spill] sm:$0xff] %v3032_v42  ;;  %v4116_v7 = vand.u32 4294901760, %v3032_v42  ;;  %v1206_v5 = vsub.f32 %v3061_v40, %v4107_v26  ;;  %v3122_v51 = vsub.f32 %v980_v6, %v3105_v53  ;;  %v3165_v10 = vsub.f32 %v974_v38, %v3145_v36  ;;  %v969_v38 = vld [vmem:[#allocation5 + $0x58] sm:$0xff] }
  0x91   :  { %v3055_v57 = vsub.f32 %v985_v27, %v3034_v15  ;;  %1031 = vmatprep.subr.mxu0 %v3034_v15  ;;  %v1188_v54 = vsub.f32 %v3048_v33, %v4111_v34  ;;  %v1177_v12 = vand.u32 4294901760, %v1176_v32  ;;  %v3136_v27 = vsub.f32 %v976_v25, %v3116_v50  ;;  %v971_v25 = vld [vmem:[#allocation5 + $0x68] sm:$0xff]  ;;  %v965_v34 = vld [vmem:[#allocation5 + $0x38] sm:$0xff] }
  0x92   :  { %v1170_v19 = vsub.f32 %v3032_v42, %v4116_v7  ;;  %1033 = vmatpush1.msra.mxu0 %v3036_v49  ;;  %v1207_v44 = vand.u32 4294901760, %v1206_v5  ;;  %v4103_v3 = vand.u32 4294901760, %v3122_v51  ;;  %v4100_v32 = vand.u32 4294901760, %v3128_v20  ;;  %4418 = vst [vmem:[#allocation11_spill] sm:$0xff] %v3165_v10  ;;  %v963_v7 = vld [vmem:[#allocation5 + $0x28] sm:$0xff] }
  0x93   :  { %v4110_v30 = vand.u32 4294901760, %v3055_v57  ;;  %1035 = vmatprep.subr.mxu0 %v3038_v55  ;;  %v1189_v17 = vand.u32 4294901760, %v1188_v54  ;;  %v1218_v54 = vsub.f32 %v3112_v8, %v4105_v48 }
  0x94   :  { %v1171_v60 = vand.u32 4294901760, %v1170_v19  ;;  %1037 = vmatpush1.msra.mxu0 %v3050_v52  ;;  %v4102_v19 = vand.u32 4294901760, %v3125_v14  ;;  %v1224_v4 = vsub.f32 %v3122_v51, %v4103_v3  ;;  %v1236_v6 = vsub.f32 %v3128_v20, %v4100_v32  ;;  %v966_v3 = vld [vmem:[#allocation5 + $0x40] sm:$0xff] }
  0x95   :  { %v1194_v2 = vsub.f32 %v3055_v57, %v4110_v30  ;;  %1039 = vmatprep.subr.mxu0 %v3103_v43  ;;  %v3179_v32 = vand.u32 4294901760, %v973_v11 }
  0x96   :  { %1172 = vmatprep.subr.mxu1 %v1171_v60  ;;  %1041 = vmatpush1.msra.mxu0 %v3105_v53  ;;  %v4098_v60 = vand.u32 4294901760, %v3136_v27  ;;  %v1230_v5 = vsub.f32 %v3125_v14, %v4102_v19  ;;  %v3189_v19 = vand.u32 4294901760, %v970_v31 }
  0x97   :  { %v1195_v61 = vand.u32 4294901760, %v1194_v2  ;;  %1178 = vmatpush1.msra.mxu1 %v1177_v12  ;;  %1043 = vmatprep.subr.mxu0 %v3107_v58  ;;  %v4101_v2 = vand.u32 4294901760, %v3139_v21  ;;  %v1219_v12 = vand.u32 4294901760, %v1218_v54 }
  0x98   :  { %1184 = vmatprep.subr.mxu1 %v1183_v16  ;;  %1045 = vmatpush1.msra.mxu0 %v3109_v59  ;;  %v1242_v16 = vsub.f32 %v3133_v22, %v4099_v46 }
  0x99   :  { %1190 = vmatpush1.msra.mxu1 %v1189_v17  ;;  %1047 = vmatprep.subr.mxu0 %v3114_v28  ;;  %v1248_v17 = vsub.f32 %v3136_v27, %v4098_v60  ;;  %v1254_v18 = vsub.f32 %v3139_v21, %v4101_v2  ;;  %v968_v2 = vld [vmem:[#allocation5 + $0x50] sm:$0xff] }
  0x9a   :  { %1196 = vmatprep.subr.mxu1 %v1195_v61  ;;  %1049 = vmatpush1.msra.mxu0 %v3116_v50  ;;  %v1225_v61 = vand.u32 4294901760, %v1224_v4  ;;  %v1243_v54 = vand.u32 4294901760, %v1242_v16  ;;  %v3192_v16 = vsub.f32 %v973_v11, %v3179_v32  ;;  %v3208_v11 = vsub.f32 %v970_v31, %v3189_v19 }
  0x9b   :  { %1202 = vmatpush1.msra.mxu1 %v1201_v13  ;;  %v1231_v13 = vand.u32 4294901760, %v1230_v5  ;;  %1051 = vmatprep.subr.mxu0 %v3118_v56  ;;  %v1249_v60 = vand.u32 4294901760, %v1248_v17  ;;  %v1255_v46 = vand.u32 4294901760, %v1254_v18  ;;  %v3185_v5 = vand.u32 4294901760, %v972_v23 }
  0x9c   :  { %1208 = vmatprep.subr.mxu1 %v1207_v44  ;;  %v1237_v44 = vand.u32 4294901760, %v1236_v6  ;;  %1053 = vmatpush1.msra.mxu0 %v3145_v36  ;;  %v3187_v6 = vand.u32 4294901760, %v971_v25  ;;  %4419 = vst [vmem:[#allocation12_spill] sm:$0xff] %v3192_v16  ;;  %v3194_v17 = vand.u32 4294901760, %v969_v38  ;;  %v3196_v18 = vand.u32 4294901760, %v968_v2  ;;  %4423 = vst [vmem:[#allocation16_spill] sm:$0xff] %v3208_v11 }
  0x9d   :  { %1214 = vmatpush1.msra.mxu1 %v1213_v63  ;;  %v4104_v63 = vand.u32 4294901760, %v3165_v10  ;;  %1055 = vmatprep.subr.mxu0 %v3179_v32  ;;  %v3202_v48 = vsub.f32 %v972_v23, %v3185_v5 }
  0x9e   :  { %1220 = vmatprep.subr.mxu1 %v1219_v12  ;;  %v967_v12 = vld [vmem:[#allocation5 + $0x48] sm:$0xff]  ;;  %v3205_v41 = vsub.f32 %v971_v25, %v3187_v6  ;;  %1057 = vmatpush1.msra.mxu0 %v3185_v5  ;;  %v3213_v26 = vsub.f32 %v969_v38, %v3194_v17 }
  0x9f   :  { %1226 = vmatpush1.msra.mxu1 %v1225_v61  ;;  %v1260_v4 = vsub.f32 %v3165_v10, %v4104_v63  ;;  %v3198_v61 = vand.u32 4294901760, %v967_v12  ;;  %4421 = vst [vmem:[#allocation14_spill] sm:$0xff] %v3202_v48  ;;  %1059 = vmatprep.subr.mxu0 %v3187_v6  ;;  %v4114_v25 = vand.u32 4294901760, %v3202_v48  ;;  %v3259_v10 = vand.u32 4294901760, %v965_v34 }
  0xa0   :  { %1232 = vmatprep.subr.mxu1 %v1231_v13  ;;  %4422 = vst [vmem:[#allocation15_spill] sm:$0xff] %v3205_v41  ;;  %v4109_v13 = vand.u32 4294901760, %v3192_v16  ;;  %4424 = vst [vmem:[#allocation17_spill] sm:$0xff] %v3213_v26  ;;  %v4115_v31 = vand.u32 4294901760, %v3205_v41  ;;  %1061 = vmatpush1.msra.mxu0 %v3189_v19  ;;  %v4126_v38 = vand.u32 4294901760, %v3213_v26 }
  0xa1   :  { %4420 = vst [vmem:[#allocation13_spill] sm:$0xff] %v3198_v61  ;;  %1238 = vmatpush1.msra.mxu1 %v1237_v44  ;;  %v1261_v63 = vand.u32 4294901760, %v1260_v4  ;;  %v3216_v44 = vsub.f32 %v968_v2, %v3196_v18  ;;  %v3219_v23 = vsub.f32 %v967_v12, %v3198_v61  ;;  %v3225_v4 = vand.u32 4294901760, %v966_v3  ;;  %1063 = vmatprep.subr.mxu0 %v3194_v17 }
  0xa2   :  { %1244 = vmatprep.subr.mxu1 %v1243_v54  ;;  %v4117_v54 = vand.u32 4294901760, %v3208_v11  ;;  %v1266_v2 = vsub.f32 %v3192_v16, %v4109_v13  ;;  %v1272_v24 = vsub.f32 %v3202_v48, %v4114_v25  ;;  %1065 = vmatpush1.msra.mxu0 %v3196_v18  ;;  %v960_v16 = vld [vmem:[#allocation5 + $0x10] sm:$0xff]  ;;  %4429 = vst [vmem:[#allocation27_spill] sm:$0xff] %v3259_v10 }
  0xa3   :  { %4425 = vst [vmem:[#allocation21_spill] sm:$0xff] %v3216_v44  ;;  %4426 = vst [vmem:[#allocation22_spill] sm:$0xff] %v3219_v23  ;;  %1250 = vmatpush1.msra.mxu1 %v1249_v60  ;;  %v4127_v12 = vand.u32 4294901760, %v3216_v44  ;;  %v4134_v60 = vand.u32 4294901760, %v3219_v23  ;;  %v3245_v30 = vsub.f32 %v966_v3, %v3225_v4  ;;  %1067 = vmatprep.subr.mxu0 %v3198_v61  ;;  %v1016_v61 = vld [vmem:[#allocation5 + $0x1d0] sm:$0xff] }
  0xa4   :  { %4427 = vst [vmem:[#allocation23_spill] sm:$0xff] %v3225_v4  ;;  %1256 = vmatprep.subr.mxu1 %v1255_v46  ;;  %v1278_v46 = vsub.f32 %v3205_v41, %v4115_v31  ;;  %v1284_v13 = vsub.f32 %v3208_v11, %v4117_v54  ;;  %v1267_v45 = vand.u32 4294901760, %v1266_v2  ;;  %v962_v54 = vld [vmem:[#allocation5 + $0x20] sm:$0xff]  ;;  %v961_v11 = vld [vmem:[#allocation5 + $0x18] sm:$0xff]  ;;  %v1273_v3 = vand.u32 4294901760, %v1272_v24  ;;  %1069 = vmatpush1.msra.mxu0 %v3225_v4 }
  0xa5   :  { %1262 = vmatpush1.msra.mxu1 %v1261_v63  ;;  %4428 = vst [vmem:[#allocation25_spill] sm:$0xff] %v3245_v30  ;;  %v1290_v63 = vsub.f32 %v3213_v26, %v4126_v38  ;;  %v1296_v25 = vsub.f32 %v3216_v44, %v4127_v12  ;;  %v1302_v31 = vsub.f32 %v3219_v23, %v4134_v60  ;;  %v4135_v48 = vand.u32 4294901760, %v3245_v30  ;;  %v959_v38 = vld [vmem:[#allocation5 + $0x8] sm:$0xff] }
  0xa6   :  { %v1279_v41 = vand.u32 4294901760, %v1278_v46  ;;  %v1285_v2 = vand.u32 4294901760, %v1284_v13  ;;  %1268 = vmatprep.subr.mxu1 %v1267_v45  ;;  %v3265_v13 = vand.u32 4294901760, %v964_v47  ;;  %v3267_v46 = vand.u32 4294901760, %v963_v7  ;;  %1071 = vmatprep.subr.mxu0 %v3259_v10 }
  0xa7   :  { %v1291_v12 = vand.u32 4294901760, %v1290_v63  ;;  %v1297_v44 = vand.u32 4294901760, %v1296_v25  ;;  %v1303_v26 = vand.u32 4294901760, %v1302_v31  ;;  %1274 = vmatpush1.msra.mxu1 %v1273_v3  ;;  %v1308_v24 = vsub.f32 %v3245_v30, %v4135_v48  ;;  %v958_v3 = vld [vmem:[#allocation5] sm:$0xff] }
  0xa8   :  { %4430 = vst [vmem:[#allocation18_spill] sm:$0xff] %v3265_v13  ;;  %4431 = vst [vmem:[#allocation19_spill] sm:$0xff] %v3267_v46  ;;  %v3269_v60 = vand.u32 4294901760, %v962_v54  ;;  %1280 = vmatprep.subr.mxu1 %v1279_v41  ;;  %v3272_v45 = vsub.f32 %v965_v34, %v3259_v10  ;;  %v3274_v25 = vand.u32 4294901760, %v961_v11  ;;  %v3276_v31 = vand.u32 4294901760, %v960_v16  ;;  %1073 = vmatpush1.msra.mxu0 %v3265_v13 }
  0xa9   :  { %v3278_v63 = vand.u32 4294901760, %v959_v38  ;;  %1286 = vmatpush1.msra.mxu1 %v1285_v2  ;;  %v1309_v48 = vand.u32 4294901760, %v1308_v24  ;;  %v3282_v30 = vsub.f32 %v964_v47, %v3265_v13  ;;  %v3285_v23 = vsub.f32 %v963_v7, %v3267_v46  ;;  %1075 = vmatprep.subr.mxu0 %v3267_v46  ;;  %v1019_v46 = vld [vmem:[#allocation5 + $0x1e8] sm:$0xff] }
  0xaa   :  { %4432 = vst [vmem:[#allocation28_spill] sm:$0xff] %v3269_v60  ;;  %4433 = vst [vmem:[#allocation20_spill] sm:$0xff] %v3272_v45  ;;  %v3288_v34 = vsub.f32 %v962_v54, %v3269_v60  ;;  %1292 = vmatprep.subr.mxu1 %v1291_v12  ;;  %v4144_v41 = vand.u32 4294901760, %v3272_v45  ;;  %v3293_v4 = vsub.f32 %v961_v11, %v3274_v25  ;;  %v3305_v24 = vand.u32 4294901760, %v958_v3 }
  0xab   :  { %4434 = vst [vmem:[#allocation26_spill] sm:$0xff] %v3274_v25  ;;  %4435 = vst [vmem:[#allocation29_spill] sm:$0xff] %v3276_v31  ;;  %v3296_v2 = vsub.f32 %v960_v16, %v3276_v31  ;;  %v3299_v47 = vsub.f32 %v959_v38, %v3278_v63  ;;  %1298 = vmatpush1.msra.mxu1 %v1297_v44  ;;  %v4149_v7 = vand.u32 4294901760, %v3282_v30  ;;  %v4152_v54 = vand.u32 4294901760, %v3285_v23  ;;  %v1021_v38 = vld [vmem:[#allocation5 + $0x1f8] sm:$0xff]  ;;  %v1020_v44 = vld [vmem:[#allocation5 + $0x1f0] sm:$0xff] }
  0xac   :  { %4436 = vst [vmem:[#allocation30_spill] sm:$0xff] %v3278_v63  ;;  %4437 = vst [vmem:[#allocation31_spill] sm:$0xff] %v3282_v30  ;;  %1077 = vmatpush1.msra.mxu0 %v3269_v60  ;;  %1304 = vmatprep.subr.mxu1 %v1303_v26  ;;  %v1314_v16 = vsub.f32 %v3272_v45, %v4144_v41  ;;  %v4444_v60 = vand.u32 4294901760, %v3288_v34  ;;  %v3325_v11 = vsub.f32 %v958_v3, %v3305_v24 }
  0xad   :  { %4438 = vst [vmem:[#allocation32_spill] sm:$0xff] %v3285_v23  ;;  %4439 = vst [vmem:[#allocation33_spill] sm:$0xff] %v3288_v34  ;;  %1079 = vmatprep.subr.mxu0 %v3274_v25  ;;  %1310 = vmatpush1.msra.mxu1 %v1309_v48  ;;  %v1320_v12 = vsub.f32 %v3282_v30, %v4149_v7  ;;  %v1326_v26 = vsub.f32 %v3285_v23, %v4152_v54  ;;  %v4446_v48 = vand.u32 4294901760, %v3293_v4 }
  0xae   :  { %4440 = vst [vmem:[#allocation34_spill] sm:$0xff] %v3293_v4  ;;  %4441 = vst [vmem:[#allocation35_spill] sm:$0xff] %v3296_v2  ;;  %v1332_v41 = vsub.f32 %v3288_v34, %v4444_v60  ;;  %v1315_v45 = vand.u32 4294901760, %v1314_v16  ;;  %v4447_v7 = vand.u32 4294901760, %v3296_v2  ;;  %v4448_v54 = vand.u32 4294901760, %v3299_v47  ;;  %v1018_v60 = vld [vmem:[#allocation5 + $0x1e0] sm:$0xff]  ;;  %1081 = vmatpush1.msra.mxu0 %v3276_v31 }
  0xaf   :  { %4442 = vst [vmem:[#allocation36_spill] sm:$0xff] %v3299_v47  ;;  %4443 = vst [vmem:[#allocation37_spill] sm:$0xff] %v3305_v24  ;;  %v1338_v25 = vsub.f32 %v3293_v4, %v4446_v48  ;;  %v1017_v34 = vld [vmem:[#allocation5 + $0x1d8] sm:$0xff]  ;;  %v1321_v3 = vand.u32 4294901760, %v1320_v12  ;;  %v1327_v13 = vand.u32 4294901760, %v1326_v26  ;;  %v4171_v10 = vand.u32 4294901760, %v3325_v11  ;;  %1083 = vmatprep.subr.mxu0 %v3278_v63 }
  0xb0   :  { %4445 = vst [vmem:[#allocation38_spill] sm:$0xff] %v3325_v11  ;;  %v1344_v30 = vsub.f32 %v3296_v2, %v4447_v7  ;;  %v1350_v23 = vsub.f32 %v3299_v47, %v4448_v54  ;;  %v1333_v16 = vand.u32 4294901760, %v1332_v41  ;;  %v1015_v48 = vld [vmem:[#allocation5 + $0x1c8] sm:$0xff]  ;;  %1316 = vmatprep.subr.mxu1 %v1315_v45  ;;  %v3339_v21 = vand.u32 4294901760, %v1021_v38  ;;  %1085 = vmatpush1.msra.mxu0 %v3305_v24  ;;  %v1008_v63 = vld [vmem:[#allocation5 + $0x190] sm:$0xff] }
  0xb1   :  { %v1339_v7 = vand.u32 4294901760, %v1338_v25  ;;  %1322 = vmatpush1.msra.mxu1 %v1321_v3  ;;  %v1356_v54 = vsub.f32 %v3325_v11, %v4171_v10  ;;  %v3345_v41 = vand.u32 4294901760, %v1020_v44  ;;  %v3347_v12 = vand.u32 4294901760, %v1019_v46  ;;  %v1014_v3 = vld [vmem:[#allocation5 + $0x1c0] sm:$0xff] }
  0xb2   :  { %v1345_v2 = vand.u32 4294901760, %v1344_v30  ;;  %v1351_v4 = vand.u32 4294901760, %v1350_v23  ;;  %4449 = vst [vmem:[#allocation39_spill] sm:$0xff] %v3339_v21  ;;  %v3349_v26 = vand.u32 4294901760, %v1018_v60  ;;  %1328 = vmatprep.subr.mxu1 %v1327_v13  ;;  %v3352_v45 = vsub.f32 %v1021_v38, %v3339_v21  ;;  %1087 = vmatprep.subr.mxu0 %v3339_v21 }
  0xb3   :  { %4450 = vst [vmem:[#allocation40_spill] sm:$0xff] %v3345_v41  ;;  %4451 = vst [vmem:[#allocation41_spill] sm:$0xff] %v3347_v12  ;;  %v3354_v30 = vand.u32 4294901760, %v1017_v34  ;;  %v3356_v23 = vand.u32 4294901760, %v1016_v61  ;;  %v3358_v25 = vand.u32 4294901760, %v1015_v48  ;;  %1334 = vmatpush1.msra.mxu1 %v1333_v16  ;;  %v1357_v10 = vand.u32 4294901760, %v1356_v54  ;;  %1089 = vmatpush2.msra.mxu0 %v3345_v41 }
  0xb4   :  { %4452 = vst [vmem:[#allocation42_spill] sm:$0xff] %v3349_v26  ;;  %4453 = vst [vmem:[#allocation43_spill] sm:$0xff] %v3352_v45  ;;  %v3362_v11 = vsub.f32 %v1020_v44, %v3345_v41  ;;  %v3365_v47 = vsub.f32 %v1019_v46, %v3347_v12  ;;  %v3368_v13 = vsub.f32 %v1018_v60, %v3349_v26  ;;  %1340 = vmatprep.subr.mxu1 %v1339_v7 }
  0xb5   :  { %4454 = vst [vmem:[#allocation44_spill] sm:$0xff] %v3354_v30  ;;  %4455 = vst [vmem:[#allocation45_spill] sm:$0xff] %v3356_v23  ;;  %v4180_v38 = vand.u32 4294901760, %v3352_v45  ;;  %v3373_v24 = vsub.f32 %v1017_v34, %v3354_v30  ;;  %v3376_v16 = vsub.f32 %v1016_v61, %v3356_v23  ;;  %v3379_v44 = vsub.f32 %v1015_v48, %v3358_v25  ;;  %v1013_v48 = vld [vmem:[#allocation5 + $0x1b8] sm:$0xff] }
  0xb6   :  { %4456 = vst [vmem:[#allocation46_spill] sm:$0xff] %v3358_v25  ;;  %4457 = vst [vmem:[#allocation47_spill] sm:$0xff] %v3362_v11  ;;  %1091 = vmatprep.subr.mxu0 %v3347_v12  ;;  %1346 = vmatpush1.msra.mxu1 %v1345_v2  ;;  %v4185_v46 = vand.u32 4294901760, %v3362_v11  ;;  %v4188_v60 = vand.u32 4294901760, %v3365_v47  ;;  %v3385_v54 = vand.u32 4294901760, %v1014_v3  ;;  %v1012_v2 = vld [vmem:[#allocation5 + $0x1b0] sm:$0xff] }
  0xb7   :  { %4458 = vst [vmem:[#allocation48_spill] sm:$0xff] %v3365_v47  ;;  %4459 = vst [vmem:[#allocation49_spill] sm:$0xff] %v3368_v13  ;;  %1093 = vmatpush2.msra.mxu0 %v3349_v26  ;;  %1352 = vmatprep.subr.mxu1 %v1351_v4  ;;  %v1362_v61 = vsub.f32 %v3352_v45, %v4180_v38  ;;  %v4464_v26 = vand.u32 4294901760, %v3368_v13  ;;  %v1011_v12 = vld [vmem:[#allocation5 + $0x1a8] sm:$0xff]  ;;  %v3419_v31 = vand.u32 4294901760, %v1013_v48 }
  0xb8   :  { %4460 = vst [vmem:[#allocation50_spill] sm:$0xff] %v3373_v24  ;;  %4461 = vst [vmem:[#allocation51_spill] sm:$0xff] %v3376_v16  ;;  %1095 = vmatprep.subr.mxu0 %v3354_v30  ;;  %1358 = vmatpush1.msra.mxu1 %v1357_v10  ;;  %v1368_v7 = vsub.f32 %v3362_v11, %v4185_v46  ;;  %v1374_v4 = vsub.f32 %v3365_v47, %v4188_v60  ;;  %v4466_v10 = vand.u32 4294901760, %v3373_v24 }
  0xb9   :  { %4462 = vst [vmem:[#allocation52_spill] sm:$0xff] %v3379_v44  ;;  %4463 = vst [vmem:[#allocation53_spill] sm:$0xff] %v3385_v54  ;;  %v1380_v38 = vsub.f32 %v3368_v13, %v4464_v26  ;;  %v3405_v34 = vsub.f32 %v1014_v3, %v3385_v54  ;;  %v1363_v45 = vand.u32 4294901760, %v1362_v61  ;;  %v4467_v46 = vand.u32 4294901760, %v3376_v16  ;;  %v1010_v26 = vld [vmem:[#allocation5 + $0x1a0] sm:$0xff]  ;;  %v1009_v13 = vld [vmem:[#allocation5 + $0x198] sm:$0xff]  ;;  %1097 = vmatpush2.msra.mxu0 %v3356_v23 }
  0xba   :  { %v1386_v30 = vsub.f32 %v3373_v24, %v4466_v10  ;;  %v4468_v60 = vand.u32 4294901760, %v3379_v44  ;;  %v1369_v3 = vand.u32 4294901760, %v1368_v7  ;;  %v1375_v41 = vand.u32 4294901760, %v1374_v4  ;;  %1099 = vmatprep.subr.mxu0 %v3358_v25  ;;  %v1007_v10 = vld [vmem:[#allocation5 + $0x188] sm:$0xff]  ;;  %4469 = vst [vmem:[#allocation55_spill] sm:$0xff] %v3419_v31  ;;  %v1000_v25 = vld [vmem:[#allocation5 + $0x150] sm:$0xff] }
  0xbb   :  { %4465 = vst [vmem:[#allocation54_spill] sm:$0xff] %v3405_v34  ;;  %v1392_v11 = vsub.f32 %v3376_v16, %v4467_v46  ;;  %v1381_v61 = vand.u32 4294901760, %v1380_v38  ;;  %v4207_v21 = vand.u32 4294901760, %v3405_v34  ;;  %1364 = vmatprep.subr.mxu1 %v1363_v45  ;;  %1101 = vmatpush2.msra.mxu0 %v3385_v54  ;;  %v3425_v38 = vand.u32 4294901760, %v1012_v2 }
  0xbc   :  { %v1398_v47 = vsub.f32 %v3379_v44, %v4468_v60  ;;  %v1387_v46 = vand.u32 4294901760, %v1386_v30  ;;  %1370 = vmatpush2.msra.mxu1 %v1369_v3  ;;  %v3427_v7 = vand.u32 4294901760, %v1011_v12  ;;  %v3429_v4 = vand.u32 4294901760, %v1010_v26  ;;  %v1006_v3 = vld [vmem:[#allocation5 + $0x180] sm:$0xff]  ;;  %1103 = vmatprep.subr.mxu0 %v3419_v31 }
  0xbd   :  { %v1393_v16 = vand.u32 4294901760, %v1392_v11  ;;  %v1404_v60 = vsub.f32 %v3405_v34, %v4207_v21  ;;  %4470 = vst [vmem:[#allocation56_spill] sm:$0xff] %v3425_v38  ;;  %1376 = vmatprep.subr.mxu1 %v1375_v41  ;;  %v3432_v45 = vsub.f32 %v1013_v48, %v3419_v31  ;;  %v3436_v11 = vand.u32 4294901760, %v1008_v63  ;;  %1105 = vmatpush2.msra.mxu0 %v3425_v38 }
  0xbe   :  { %v1399_v24 = vand.u32 4294901760, %v1398_v47  ;;  %4471 = vst [vmem:[#allocation57_spill] sm:$0xff] %v3427_v7  ;;  %4472 = vst [vmem:[#allocation58_spill] sm:$0xff] %v3429_v4  ;;  %v3434_v47 = vand.u32 4294901760, %v1009_v13  ;;  %v3438_v30 = vand.u32 4294901760, %v1007_v10  ;;  %1382 = vmatpush2.msra.mxu1 %v1381_v61  ;;  %v3442_v34 = vsub.f32 %v1012_v2, %v3425_v38  ;;  %1107 = vmatprep.subr.mxu0 %v3427_v7 }
  0xbf   :  { %4473 = vst [vmem:[#allocation59_spill] sm:$0xff] %v3432_v45  ;;  %4475 = vst [vmem:[#allocation61_spill] sm:$0xff] %v3436_v11  ;;  %v1405_v21 = vand.u32 4294901760, %v1404_v60  ;;  %v3445_v44 = vsub.f32 %v1011_v12, %v3427_v7  ;;  %v3448_v41 = vsub.f32 %v1010_v26, %v3429_v4  ;;  %1388 = vmatprep.subr.mxu1 %v1387_v46  ;;  %v4216_v48 = vand.u32 4294901760, %v3432_v45  ;;  %v1003_v7 = vld [vmem:[#allocation5 + $0x168] sm:$0xff] }
  0xc0   :  { %4474 = vst [vmem:[#allocation60_spill] sm:$0xff] %v3434_v47  ;;  %4476 = vst [vmem:[#allocation62_spill] sm:$0xff] %v3438_v30  ;;  %v3453_v54 = vsub.f32 %v1009_v13, %v3434_v47  ;;  %v3456_v61 = vsub.f32 %v1008_v63, %v3436_v11  ;;  %v3459_v2 = vsub.f32 %v1007_v10, %v3438_v30  ;;  %1394 = vmatpush2.msra.mxu1 %v1393_v16  ;;  %v1005_v10 = vld [vmem:[#allocation5 + $0x178] sm:$0xff]  ;;  %v1004_v16 = vld [vmem:[#allocation5 + $0x170] sm:$0xff] }
  0xc1   :  { %4477 = vst [vmem:[#allocation63_spill] sm:$0xff] %v3442_v34  ;;  %4478 = vst [vmem:[#allocation64_spill] sm:$0xff] %v3445_v44  ;;  %v4221_v12 = vand.u32 4294901760, %v3442_v34  ;;  %v4224_v26 = vand.u32 4294901760, %v3445_v44  ;;  %v3465_v60 = vand.u32 4294901760, %v1006_v3  ;;  %1109 = vmatpush2.msra.mxu0 %v3429_v4  ;;  %1400 = vmatprep.subr.mxu1 %v1399_v24  ;;  %v1410_v63 = vsub.f32 %v3432_v45, %v4216_v48 }
  0xc2   :  { %4479 = vst [vmem:[#allocation65_spill] sm:$0xff] %v3448_v41  ;;  %4480 = vst [vmem:[#allocation66_spill] sm:$0xff] %v3453_v54  ;;  %1111 = vmatprep.subr.mxu0 %v3434_v47  ;;  %1406 = vmatpush2.msra.mxu1 %v1405_v21  ;;  %v4484_v4 = vand.u32 4294901760, %v3448_v41  ;;  %v4486_v21 = vand.u32 4294901760, %v3453_v54  ;;  %v3499_v23 = vand.u32 4294901760, %v1005_v10 }
  0xc3   :  { %4481 = vst [vmem:[#allocation67_spill] sm:$0xff] %v3456_v61  ;;  %4482 = vst [vmem:[#allocation68_spill] sm:$0xff] %v3459_v2  ;;  %v1416_v46 = vsub.f32 %v3442_v34, %v4221_v12  ;;  %v1422_v24 = vsub.f32 %v3445_v44, %v4224_v26  ;;  %v3485_v13 = vsub.f32 %v1006_v3, %v3465_v60  ;;  %v1411_v45 = vand.u32 4294901760, %v1410_v63 }
  0xc4   :  { %4483 = vst [vmem:[#allocation69_spill] sm:$0xff] %v3465_v60  ;;  %v1428_v48 = vsub.f32 %v3448_v41, %v4484_v4  ;;  %v1434_v47 = vsub.f32 %v3453_v54, %v4486_v21  ;;  %v4487_v12 = vand.u32 4294901760, %v3456_v61  ;;  %v4488_v26 = vand.u32 4294901760, %v3459_v2  ;;  %v1002_v4 = vld [vmem:[#allocation5 + $0x160] sm:$0xff]  ;;  %v1001_v41 = vld [vmem:[#allocation5 + $0x158] sm:$0xff]  ;;  %1113 = vmatpush2.msra.mxu0 %v3436_v11  ;;  %v999_v21 = vld [vmem:[#allocation5 + $0x148] sm:$0xff] }
  0xc5   :  { %4485 = vst [vmem:[#allocation70_spill] sm:$0xff] %v3485_v13  ;;  %v1417_v3 = vand.u32 4294901760, %v1416_v46  ;;  %v1423_v38 = vand.u32 4294901760, %v1422_v24  ;;  %v4243_v31 = vand.u32 4294901760, %v3485_v13  ;;  %1115 = vmatprep.subr.mxu0 %v3438_v30  ;;  %1412 = vmatprep.subr.mxu1 %v1411_v45  ;;  %4489 = vst [vmem:[#allocation71_spill] sm:$0xff] %v3499_v23  ;;  %v3507_v46 = vand.u32 4294901760, %v1003_v7 }
  0xc6   :  { %v1440_v34 = vsub.f32 %v3456_v61, %v4487_v12  ;;  %v1446_v44 = vsub.f32 %v3459_v2, %v4488_v26  ;;  %v1429_v63 = vand.u32 4294901760, %v1428_v48  ;;  %v1435_v12 = vand.u32 4294901760, %v1434_v47  ;;  %1117 = vmatpush2.msra.mxu0 %v3465_v60  ;;  %v992_v30 = vld [vmem:[#allocation5 + $0x110] sm:$0xff] }
  0xc7   :  { %1418 = vmatpush2.msra.mxu1 %v1417_v3  ;;  %v1452_v26 = vsub.f32 %v3485_v13, %v4243_v31  ;;  %v3505_v48 = vand.u32 4294901760, %v1004_v16  ;;  %4491 = vst [vmem:[#allocation73_spill] sm:$0xff] %v3507_v46  ;;  %v3509_v24 = vand.u32 4294901760, %v1002_v4  ;;  %v3512_v45 = vsub.f32 %v1005_v10, %v3499_v23  ;;  %v998_v3 = vld [vmem:[#allocation5 + $0x140] sm:$0xff]  ;;  %1119 = vmatprep.subr.mxu0 %v3499_v23 }
  0xc8   :  { %v1441_v61 = vand.u32 4294901760, %v1440_v34  ;;  %v1447_v54 = vand.u32 4294901760, %v1446_v44  ;;  %1424 = vmatprep.subr.mxu1 %v1423_v38  ;;  %v3514_v44 = vand.u32 4294901760, %v1001_v41  ;;  %v3516_v34 = vand.u32 4294901760, %v1000_v25 }
  0xc9   :  { %4490 = vst [vmem:[#allocation72_spill] sm:$0xff] %v3505_v48  ;;  %4492 = vst [vmem:[#allocation74_spill] sm:$0xff] %v3509_v24  ;;  %v3518_v47 = vand.u32 4294901760, %v999_v21  ;;  %1430 = vmatpush2.msra.mxu1 %v1429_v63  ;;  %v1453_v31 = vand.u32 4294901760, %v1452_v26  ;;  %v3522_v13 = vsub.f32 %v1004_v16, %v3505_v48  ;;  %v3525_v2 = vsub.f32 %v1003_v7, %v3507_v46 }
  0xca   :  { %4493 = vst [vmem:[#allocation75_spill] sm:$0xff] %v3512_v45  ;;  %4494 = vst [vmem:[#allocation76_spill] sm:$0xff] %v3514_v44  ;;  %v3528_v38 = vsub.f32 %v1002_v4, %v3509_v24  ;;  %1121 = vmatpush2.msra.mxu0 %v3505_v48  ;;  %1436 = vmatprep.subr.mxu1 %v1435_v12  ;;  %v4252_v10 = vand.u32 4294901760, %v3512_v45  ;;  %v3533_v60 = vsub.f32 %v1001_v41, %v3514_v44 }
  0xcb   :  { %4495 = vst [vmem:[#allocation77_spill] sm:$0xff] %v3516_v34  ;;  %4496 = vst [vmem:[#allocation78_spill] sm:$0xff] %v3518_v47  ;;  %v3536_v63 = vsub.f32 %v1000_v25, %v3516_v34  ;;  %v3539_v16 = vsub.f32 %v999_v21, %v3518_v47  ;;  %1123 = vmatprep.subr.mxu0 %v3507_v46  ;;  %1442 = vmatpush2.msra.mxu1 %v1441_v61  ;;  %v4257_v7 = vand.u32 4294901760, %v3522_v13  ;;  %v997_v21 = vld [vmem:[#allocation5 + $0x138] sm:$0xff]  ;;  %v996_v61 = vld [vmem:[#allocation5 + $0x130] sm:$0xff] }
  0xcc   :  { %4497 = vst [vmem:[#allocation79_spill] sm:$0xff] %v3522_v13  ;;  %4498 = vst [vmem:[#allocation80_spill] sm:$0xff] %v3525_v2  ;;  %v4260_v4 = vand.u32 4294901760, %v3525_v2  ;;  %v3545_v26 = vand.u32 4294901760, %v998_v3  ;;  %1125 = vmatpush2.msra.mxu0 %v3509_v24  ;;  %1448 = vmatprep.subr.mxu1 %v1447_v54  ;;  %v1458_v25 = vsub.f32 %v3512_v45, %v4252_v10  ;;  %v4504_v24 = vand.u32 4294901760, %v3528_v38  ;;  %v995_v46 = vld [vmem:[#allocation5 + $0x128] sm:$0xff] }
  0xcd   :  { %4499 = vst [vmem:[#allocation81_spill] sm:$0xff] %v3528_v38  ;;  %4500 = vst [vmem:[#allocation82_spill] sm:$0xff] %v3533_v60  ;;  %1127 = vmatprep.subr.mxu0 %v3514_v44  ;;  %1454 = vmatpush2.msra.mxu1 %v1453_v31  ;;  %v1464_v12 = vsub.f32 %v3522_v13, %v4257_v7  ;;  %v4506_v31 = vand.u32 4294901760, %v3533_v60  ;;  %v4507_v7 = vand.u32 4294901760, %v3536_v63  ;;  %v3579_v11 = vand.u32 4294901760, %v997_v21 }
  0xce   :  { %4501 = vst [vmem:[#allocation83_spill] sm:$0xff] %v3536_v63  ;;  %4502 = vst [vmem:[#allocation84_spill] sm:$0xff] %v3539_v16  ;;  %v1470_v54 = vsub.f32 %v3525_v2, %v4260_v4  ;;  %v1476_v10 = vsub.f32 %v3528_v38, %v4504_v24  ;;  %v3565_v41 = vsub.f32 %v998_v3, %v3545_v26  ;;  %v1459_v45 = vand.u32 4294901760, %v1458_v25  ;;  %v994_v24 = vld [vmem:[#allocation5 + $0x120] sm:$0xff]  ;;  %v993_v38 = vld [vmem:[#allocation5 + $0x118] sm:$0xff] }
  0xcf   :  { %4503 = vst [vmem:[#allocation85_spill] sm:$0xff] %v3545_v26  ;;  %v1482_v44 = vsub.f32 %v3533_v60, %v4506_v31  ;;  %v1488_v13 = vsub.f32 %v3536_v63, %v4507_v7  ;;  %v4508_v4 = vand.u32 4294901760, %v3539_v16  ;;  %1129 = vmatpush2.msra.mxu0 %v3516_v34  ;;  %v1465_v3 = vand.u32 4294901760, %v1464_v12  ;;  %v991_v31 = vld [vmem:[#allocation5 + $0x108] sm:$0xff]  ;;  %4509 = vst [vmem:[#allocation87_spill] sm:$0xff] %v3579_v11 }
  0xd0   :  { %4505 = vst [vmem:[#allocation86_spill] sm:$0xff] %v3565_v41  ;;  %v1471_v48 = vand.u32 4294901760, %v1470_v54  ;;  %v1477_v25 = vand.u32 4294901760, %v1476_v10  ;;  %v4279_v23 = vand.u32 4294901760, %v3565_v41  ;;  %1131 = vmatprep.subr.mxu0 %v3518_v47  ;;  %1460 = vmatprep.subr.mxu1 %v1459_v45  ;;  %v3585_v10 = vand.u32 4294901760, %v996_v61 }
  0xd1   :  { %v1494_v2 = vsub.f32 %v3539_v16, %v4508_v4  ;;  %v1483_v7 = vand.u32 4294901760, %v1482_v44  ;;  %v1489_v63 = vand.u32 4294901760, %v1488_v13  ;;  %1133 = vmatpush2.msra.mxu0 %v3545_v26  ;;  %1466 = vmatpush2.msra.mxu1 %v1465_v3  ;;  %v3587_v12 = vand.u32 4294901760, %v995_v46  ;;  %v990_v3 = vld [vmem:[#allocation5 + $0x100] sm:$0xff] }
  0xd2   :  { %v1500_v4 = vsub.f32 %v3565_v41, %v4279_v23  ;;  %4510 = vst [vmem:[#allocation88_spill] sm:$0xff] %v3585_v10  ;;  %v3589_v54 = vand.u32 4294901760, %v994_v24  ;;  %1472 = vmatprep.subr.mxu1 %v1471_v48  ;;  %v3592_v45 = vsub.f32 %v997_v21, %v3579_v11  ;;  %v3596_v13 = vand.u32 4294901760, %v992_v30  ;;  %1135 = vmatprep.subr.mxu0 %v3579_v11 }
  0xd3   :  { %v1495_v60 = vand.u32 4294901760, %v1494_v2  ;;  %4511 = vst [vmem:[#allocation89_spill] sm:$0xff] %v3587_v12  ;;  %v3594_v2 = vand.u32 4294901760, %v993_v38  ;;  %v3598_v44 = vand.u32 4294901760, %v991_v31  ;;  %1478 = vmatpush2.msra.mxu1 %v1477_v25  ;;  %v3602_v41 = vsub.f32 %v996_v61, %v3585_v10  ;;  %1137 = vmatpush2.msra.mxu0 %v3585_v10 }
  0xd4   :  { %4512 = vst [vmem:[#allocation90_spill] sm:$0xff] %v3589_v54  ;;  %4513 = vst [vmem:[#allocation91_spill] sm:$0xff] %v3592_v45  ;;  %v1501_v23 = vand.u32 4294901760, %v1500_v4  ;;  %v3605_v16 = vsub.f32 %v995_v46, %v3587_v12  ;;  %v3608_v48 = vsub.f32 %v994_v24, %v3589_v54  ;;  %1484 = vmatprep.subr.mxu1 %v1483_v7  ;;  %v4288_v21 = vand.u32 4294901760, %v3592_v45 }
  0xd5   :  { %4514 = vst [vmem:[#allocation92_spill] sm:$0xff] %v3594_v2  ;;  %4515 = vst [vmem:[#allocation93_spill] sm:$0xff] %v3596_v13  ;;  %v3613_v26 = vsub.f32 %v993_v38, %v3594_v2  ;;  %v3616_v25 = vsub.f32 %v992_v30, %v3596_v13  ;;  %v3619_v61 = vsub.f32 %v991_v31, %v3598_v44  ;;  %1139 = vmatprep.subr.mxu0 %v3587_v12 }
  0xd6   :  { %4516 = vst [vmem:[#allocation94_spill] sm:$0xff] %v3598_v44  ;;  %4517 = vst [vmem:[#allocation95_spill] sm:$0xff] %v3602_v41  ;;  %1490 = vmatpush2.msra.mxu1 %v1489_v63  ;;  %v4291_v46 = vand.u32 4294901760, %v3602_v41  ;;  %v4294_v24 = vand.u32 4294901760, %v3605_v16  ;;  %v3625_v4 = vand.u32 4294901760, %v990_v3  ;;  %1141 = vmatpush2.msra.mxu0 %v3589_v54  ;;  %v1506_v30 = vsub.f32 %v3592_v45, %v4288_v21 }
  0xd7   :  { %4518 = vst [vmem:[#allocation96_spill] sm:$0xff] %v3605_v16  ;;  %4519 = vst [vmem:[#allocation97_spill] sm:$0xff] %v3608_v48  ;;  %1496 = vmatprep.subr.mxu1 %v1495_v60  ;;  %1143 = vmatprep.subr.mxu0 %v3594_v2  ;;  %v4524_v54 = vand.u32 4294901760, %v3608_v48  ;;  %v4526_v63 = vand.u32 4294901760, %v3613_v26  ;;  %v4527_v45 = vand.u32 4294901760, %v3616_v25 }
  0xd8   :  { %4520 = vst [vmem:[#allocation98_spill] sm:$0xff] %v3613_v26  ;;  %4521 = vst [vmem:[#allocation99_spill] sm:$0xff] %v3616_v25  ;;  %1502 = vmatpush2.msra.mxu1 %v1501_v23  ;;  %v1512_v7 = vsub.f32 %v3602_v41, %v4291_v46  ;;  %v1518_v60 = vsub.f32 %v3605_v16, %v4294_v24  ;;  %v3645_v38 = vsub.f32 %v990_v3, %v3625_v4 }
  0xd9   :  { %4522 = vst [vmem:[#allocation100_spill] sm:$0xff] %v3619_v61  ;;  %4523 = vst [vmem:[#allocation101_spill] sm:$0xff] %v3625_v4  ;;  %v1524_v21 = vsub.f32 %v3608_v48, %v4524_v54  ;;  %v1507_v31 = vand.u32 4294901760, %v1506_v30  ;;  %v1530_v23 = vsub.f32 %v3613_v26, %v4526_v63  ;;  %v1536_v46 = vsub.f32 %v3616_v25, %v4527_v45 }
  0xda   :  { %4525 = vst [vmem:[#allocation102_spill] sm:$0xff] %v3645_v38  ;;  %v4528_v41 = vand.u32 4294901760, %v3619_v61  ;;  %1145 = vmatpush2.msra.mxu0 %v3596_v13  ;;  %v1513_v16 = vand.u32 4294901760, %v1512_v7  ;;  %v1519_v54 = vand.u32 4294901760, %v1518_v60  ;;  %v4299_v3 = vand.u32 4294901760, %v3645_v38 }
  0xdb   :  { %v1525_v48 = vand.u32 4294901760, %v1524_v21  ;;  %1147 = vmatprep.subr.mxu0 %v3598_v44  ;;  %1508 = vmatprep.subr.mxu1 %v1507_v31  ;;  %v1531_v30 = vand.u32 4294901760, %v1530_v23  ;;  %v1537_v63 = vand.u32 4294901760, %v1536_v46  ;;  %v89_v7 = vlaneseq  ;;  %v87_v46 = vld [vmem:[%s4030_s2] sm:$0x3] }
  0xdc   :  { %v1542_v24 = vsub.f32 %v3619_v61, %v4528_v41  ;;  %1149 = vmatpush2.msra.mxu0 %v3625_v4  ;;  %1514 = vmatpush2.msra.mxu1 %v1513_v16  ;;  %v1548_v45 = vsub.f32 %v3645_v38, %v4299_v3 }
  0xdd   :  { %1562 = vmatprep.subr.mxu0 %v3032_v42  ;;  %1520 = vmatprep.subr.mxu1 %v1519_v54  ;;  %v3665_v31 = vshrl.u32 %v89_v7, 7 }
  0xde   :  { %v1543_v41 = vand.u32 4294901760, %v1542_v24  ;;  %1526 = vmatpush2.msra.mxu1 %v1525_v48  ;;  %v1549_v21 = vand.u32 4294901760, %v1548_v45 }
  0xdf   :  { %1532 = vmatprep.subr.mxu1 %v1531_v30  ;;  %4529 = vst [vmem:[#allocation103_spill] sm:$0xff] %v3665_v31  ;;  %v4314_v16 = vsub.s32 0, %v3665_v31  ;;  %v4323_v24 = vsub.s32 1, %v3665_v31 }
  0xe0   :  { %1538 = vmatpush2.msra.mxu1 %v1537_v63 }
  0xe1   :  { %1544 = vmatprep.subr.mxu1 %v1543_v41  ;;  %v92_v48 = vrot.slane %v87_v46, %v4314_v16  ;;  %v96_v30 = vrot.slane %v87_v46, %v4323_v24 }
  0xe2   :  { %1550 = vmatpush2.msra.mxu1 %v1549_v21 }
  0xe3   :  { %1764 = vmatprep.subr.mxu1 %v3022_v0 }
 0x106   :  { %v202_v60 = vpop.f32.mrf.mxu0 }
 0x107   :  { %v203_v45 = vadd.f32 %v202_v60, %v92_v48 }
 0x108   :  { %v204_v23 = vpop.f32.mrf.mxu0 }
 0x109   :  { %v205_v21 = vadd.f32 %v204_v23, %v96_v30 }
 0x10d   :  { %v434_v54 = vpop.f32.mrf.mxu1 }
 0x10e   :  { %v435_v42 = vadd.f32 %v434_v54, %v203_v45  ;;  %v4540_v45 = vld [vmem:[#allocation19_spill] sm:$0xff] }
 0x10f   :  { %v436_v41 = vpop.f32.mrf.mxu1 }
 0x110   :  { %v437_v61 = vadd.f32 %v436_v41, %v205_v21  ;;  %v4541_v41 = vld [vmem:[#allocation16_spill] sm:$0xff] }
 0x111   :  { %v4542_v21 = vld [vmem:[#allocation28_spill] sm:$0xff] }
 0x126   :  { %v571_v63 = vpop.f32.mrf.mxu0 }
 0x127   :  { %v572_v25 = vadd.f32 %v571_v63, %v435_v42  ;;  %v4539_v63 = vld [vmem:[#allocation15_spill] sm:$0xff] }
 0x128   :  { %v573_v7 = vpop.f32.mrf.mxu0 }
 0x129   :  { %v574_v0 = vadd.f32 %v573_v7, %v437_v61  ;;  %v4532_v61 = vld [vmem:[#allocation13_spill] sm:$0xff] }
 0x12a   :  { %v4543_v7 = vld [vmem:[#allocation17_spill] sm:$0xff] }
 0x12f   :  { %v677_v3 = vpop.f32.mrf.mxu1 }
 0x130   :  { %v678_v4 = vadd.f32 %v677_v3, %v572_v25  ;;  %v4535_v3 = vld [vmem:[#allocation12_spill] sm:$0xff] }
 0x131   :  { %v679_v26 = vpop.f32.mrf.mxu1 }
 0x132   :  { %v680_v16 = vadd.f32 %v679_v26, %v574_v0 }
 0x148   :  { %v845_v38 = vpop.f32.mrf.mxu0 }
 0x149   :  { %v846_v13 = vadd.f32 %v845_v38, %v678_v4  ;;  %v4533_v4 = vld [vmem:[#allocation11_spill] sm:$0xff] }
 0x14a   :  { %v847_v44 = vpop.f32.mrf.mxu0  ;;  %v4534_v38 = vld [vmem:[#allocation23_spill] sm:$0xff] }
 0x14b   :  { %v848_v12 = vadd.f32 %v847_v44, %v680_v16  ;;  %v4531_v44 = vld [vmem:[#allocation10_spill] sm:$0xff] }
 0x14c   :  { %v4537_v16 = vld [vmem:[#allocation14_spill] sm:$0xff] }
 0x150   :  { %v949_v2 = vpop.f32.mrf.mxu1 }
 0x151   :  { %v950_v31 = vadd.f32 %v949_v2, %v846_v13 }
 0x152   :  { %v951_v46 = vpop.f32.mrf.mxu1 }
 0x153   :  { %v954_v24 = vmax.f32 %v950_v31, 0.0  ;;  %v952_v60 = vadd.f32 %v951_v46, %v848_v12  ;;  %v4536_v31 = vld [vmem:[#allocation27_spill] sm:$0xff]  ;;  %v4544_v46 = vld [vmem:[#allocation26_spill] sm:$0xff] }
 0x155   :  { %v3676_v48 = vand.u32 4294901760, %v954_v24  ;;  %v955_v23 = vmax.f32 %v952_v60, 0.0  ;;  %v4545_v60 = vld [vmem:[#allocation21_spill] sm:$0xff] }
 0x157   :  { %4530 = vst [vmem:[#allocation104_spill] sm:$0xff] %v3676_v48  ;;  %v3679_v54 = vsub.f32 %v954_v24, %v3676_v48  ;;  %v3681_v30 = vand.u32 4294901760, %v955_v23  ;;  %v4538_v24 = vld [vmem:[#allocation18_spill] sm:$0xff] }
 0x159   :  { %v4324_v42 = vand.u32 4294901760, %v3679_v54  ;;  %v1151_v25 = vsub.f32 %v955_v23, %v3681_v30  ;;  %1552 = vmatprep.mubr.f32.mxu1 %v3681_v30  ;;  %v4546_v23 = vld [vmem:[#allocation29_spill] sm:$0xff] }
 0x15a   :  { %1554 = vmatmul.mubr.f32.vlgmr.msra.gmra.mxu1 %v3676_v48  ;;  %v4554_v48 = vld [vmem:[#allocation40_spill] sm:$0xff] }
 0x15b   :  { %1766 = vmatpush1.msra.mxu1 %v3025_v37  ;;  %v1152_v0 = vand.u32 4294901760, %v1151_v25  ;;  %v1159_v26 = vsub.f32 %v3679_v54, %v4324_v42  ;;  %v4553_v42 = vld [vmem:[#allocation31_spill] sm:$0xff] }
 0x15c   :  { %1768 = vmatprep.subr.mxu1 %v3027_v62 }
 0x15d   :  { %1770 = vmatpush1.msra.mxu1 %v3029_v1  ;;  %1894 = vmatprep.mubr.f32.mxu1 %v1152_v0  ;;  %v1153_v12 = vsub.f32 %v1151_v25, %v1152_v0  ;;  %v1160_v13 = vand.u32 4294901760, %v1159_v26  ;;  %v4548_v0 = vld [vmem:[#allocation30_spill] sm:$0xff]  ;;  %v4549_v26 = vld [vmem:[#allocation25_spill] sm:$0xff] }
 0x15e   :  { %1772 = vmatprep.subr.mxu1 %v3034_v15 }
 0x15f   :  { %1774 = vmatpush1.msra.mxu1 %v3036_v49  ;;  %v1154_v2 = vand.u32 4294901760, %v1153_v12  ;;  %v4550_v12 = vld [vmem:[#allocation37_spill] sm:$0xff] }
 0x160   :  { %1776 = vmatprep.subr.mxu1 %v3038_v55 }
 0x161   :  { %1778 = vmatpush1.msra.mxu1 %v3050_v52  ;;  %1155 = vmatprep.mubr.f32.mxu0 %v1154_v2  ;;  %v4551_v2 = vld [vmem:[#allocation20_spill] sm:$0xff] }
 0x162   :  { %1780 = vmatprep.subr.mxu1 %v3103_v43  ;;  %1161 = vmatmul.mubr.f32.vlgmr.msra.gmra.mxu0 %v1160_v13  ;;  %v4552_v13 = vld [vmem:[#allocation39_spill] sm:$0xff] }
 0x163   :  { %1565 = vmatpush1.msra.mxu0 %v3042_v9  ;;  %1782 = vmatpush1.msra.mxu1 %v3105_v53 }
 0x164   :  { %1568 = vmatprep.subr.mxu0 %v3045_v35  ;;  %1754 = vmatprep.mubr.f32.mxu0 %v1151_v25  ;;  %v4547_v25 = vld [vmem:[#allocation22_spill] sm:$0xff] }
 0x165   :  { %1784 = vmatprep.subr.mxu1 %v3107_v58  ;;  %1571 = vmatpush1.msra.mxu0 %v3048_v33 }
 0x166   :  { %1786 = vmatpush1.msra.mxu1 %v3109_v59  ;;  %1574 = vmatprep.subr.mxu0 %v3055_v57 }
 0x167   :  { %1788 = vmatprep.subr.mxu1 %v3114_v28  ;;  %1577 = vmatpush1.msra.mxu0 %v3058_v39 }
 0x168   :  { %1790 = vmatpush1.msra.mxu1 %v3116_v50  ;;  %1580 = vmatprep.subr.mxu0 %v3061_v40 }
 0x169   :  { %1792 = vmatprep.subr.mxu1 %v3118_v56  ;;  %1583 = vmatpush1.msra.mxu0 %v3068_v29 }
 0x16a   :  { %1794 = vmatpush1.msra.mxu1 %v3145_v36  ;;  %1586 = vmatprep.subr.mxu0 %v3112_v8 }
 0x16b   :  { %1796 = vmatprep.subr.mxu1 %v3179_v32  ;;  %1589 = vmatpush1.msra.mxu0 %v3122_v51 }
 0x16c   :  { %1798 = vmatpush1.msra.mxu1 %v3185_v5  ;;  %1592 = vmatprep.subr.mxu0 %v3125_v14 }
 0x16d   :  { %1800 = vmatprep.subr.mxu1 %v3187_v6  ;;  %1595 = vmatpush1.msra.mxu0 %v3128_v20 }
 0x16e   :  { %1802 = vmatpush1.msra.mxu1 %v3189_v19  ;;  %1598 = vmatprep.subr.mxu0 %v3133_v22 }
 0x16f   :  { %1804 = vmatprep.subr.mxu1 %v3194_v17  ;;  %1601 = vmatpush1.msra.mxu0 %v3136_v27 }
 0x170   :  { %1806 = vmatpush1.msra.mxu1 %v3196_v18  ;;  %1604 = vmatprep.subr.mxu0 %v4531_v44 }
 0x171   :  { %1808 = vmatprep.subr.mxu1 %v4532_v61  ;;  %1607 = vmatpush1.msra.mxu0 %v4533_v4 }
 0x172   :  { %1810 = vmatpush1.msra.mxu1 %v4534_v38  ;;  %1610 = vmatprep.subr.mxu0 %v4535_v3 }
 0x173   :  { %1812 = vmatprep.subr.mxu1 %v4536_v31  ;;  %1613 = vmatpush1.msra.mxu0 %v4537_v16 }
 0x174   :  { %1814 = vmatpush1.msra.mxu1 %v4538_v24  ;;  %1616 = vmatprep.subr.mxu0 %v4539_v63 }
 0x175   :  { %1816 = vmatprep.subr.mxu1 %v4540_v45  ;;  %1619 = vmatpush1.msra.mxu0 %v4541_v41 }
 0x176   :  { %1818 = vmatpush1.msra.mxu1 %v4542_v21  ;;  %1622 = vmatprep.subr.mxu0 %v4543_v7 }
 0x177   :  { %1820 = vmatprep.subr.mxu1 %v4544_v46  ;;  %1625 = vmatpush1.msra.mxu0 %v4545_v60  ;;  %v4555_v46 = vld [vmem:[#allocation32_spill] sm:$0xff]  ;;  %v4556_v60 = vld [vmem:[#allocation41_spill] sm:$0xff] }
 0x178   :  { %1822 = vmatpush1.msra.mxu1 %v4546_v23  ;;  %1628 = vmatprep.subr.mxu0 %v4547_v25  ;;  %v4557_v23 = vld [vmem:[#allocation33_spill] sm:$0xff]  ;;  %v4558_v25 = vld [vmem:[#allocation42_spill] sm:$0xff] }
 0x179   :  { %1824 = vmatprep.subr.mxu1 %v4548_v0  ;;  %1631 = vmatpush1.msra.mxu0 %v4549_v26  ;;  %v4559_v0 = vld [vmem:[#allocation34_spill] sm:$0xff]  ;;  %v4560_v26 = vld [vmem:[#allocation44_spill] sm:$0xff] }
 0x17a   :  { %1826 = vmatpush1.msra.mxu1 %v4550_v12  ;;  %1634 = vmatprep.subr.mxu0 %v4551_v2  ;;  %v4561_v12 = vld [vmem:[#allocation35_spill] sm:$0xff]  ;;  %v4562_v2 = vld [vmem:[#allocation45_spill] sm:$0xff] }
 0x17b   :  { %1828 = vmatprep.subr.mxu1 %v4552_v13  ;;  %1637 = vmatpush1.msra.mxu0 %v4553_v42  ;;  %v4563_v13 = vld [vmem:[#allocation36_spill] sm:$0xff]  ;;  %v4564_v42 = vld [vmem:[#allocation46_spill] sm:$0xff] }
 0x17c   :  { %1830 = vmatpush2.msra.mxu1 %v4554_v48  ;;  %1640 = vmatprep.subr.mxu0 %v4555_v46  ;;  %v4565_v48 = vld [vmem:[#allocation38_spill] sm:$0xff]  ;;  %v4566_v46 = vld [vmem:[#allocation53_spill] sm:$0xff] }
 0x17d   :  { %1832 = vmatprep.subr.mxu1 %v4556_v60  ;;  %1643 = vmatpush1.msra.mxu0 %v4557_v23  ;;  %v4567_v60 = vld [vmem:[#allocation43_spill] sm:$0xff] }
 0x17e   :  { %1834 = vmatpush2.msra.mxu1 %v4558_v25  ;;  %1646 = vmatprep.subr.mxu0 %v4559_v0  ;;  %v4568_v23 = vld [vmem:[#allocation55_spill] sm:$0xff]  ;;  %v4570_v0 = vld [vmem:[#allocation56_spill] sm:$0xff] }
 0x17f   :  { %1836 = vmatprep.subr.mxu1 %v4560_v26  ;;  %1649 = vmatpush1.msra.mxu0 %v4561_v12  ;;  %v4569_v25 = vld [vmem:[#allocation47_spill] sm:$0xff]  ;;  %v4571_v26 = vld [vmem:[#allocation48_spill] sm:$0xff]  ;;  %v4572_v12 = vld [vmem:[#allocation57_spill] sm:$0xff] }
 0x180   :  { %1838 = vmatpush2.msra.mxu1 %v4562_v2  ;;  %1652 = vmatprep.subr.mxu0 %v4563_v13  ;;  %v4573_v2 = vld [vmem:[#allocation49_spill] sm:$0xff]  ;;  %v4574_v13 = vld [vmem:[#allocation58_spill] sm:$0xff] }
 0x181   :  { %1840 = vmatprep.subr.mxu1 %v4564_v42  ;;  %1655 = vmatpush1.msra.mxu0 %v4565_v48  ;;  %v4575_v42 = vld [vmem:[#allocation50_spill] sm:$0xff]  ;;  %v4576_v48 = vld [vmem:[#allocation60_spill] sm:$0xff] }
 0x182   :  { %1842 = vmatpush2.msra.mxu1 %v4566_v46  ;;  %1658 = vmatprep.subr.mxu0 %v4567_v60  ;;  %v4577_v46 = vld [vmem:[#allocation51_spill] sm:$0xff]  ;;  %v4578_v60 = vld [vmem:[#allocation61_spill] sm:$0xff] }
 0x183   :  { %1844 = vmatprep.subr.mxu1 %v4568_v23  ;;  %1661 = vmatpush2.msra.mxu0 %v4569_v25  ;;  %v4579_v23 = vld [vmem:[#allocation52_spill] sm:$0xff]  ;;  %v4580_v25 = vld [vmem:[#allocation62_spill] sm:$0xff] }
 0x184   :  { %1846 = vmatpush2.msra.mxu1 %v4570_v0  ;;  %1664 = vmatprep.subr.mxu0 %v4571_v26  ;;  %v4581_v0 = vld [vmem:[#allocation54_spill] sm:$0xff]  ;;  %v4582_v26 = vld [vmem:[#allocation69_spill] sm:$0xff] }
 0x185   :  { %1848 = vmatprep.subr.mxu1 %v4572_v12  ;;  %1667 = vmatpush2.msra.mxu0 %v4573_v2  ;;  %v4583_v12 = vld [vmem:[#allocation59_spill] sm:$0xff] }
 0x186   :  { %1850 = vmatpush2.msra.mxu1 %v4574_v13  ;;  %1670 = vmatprep.subr.mxu0 %v4575_v42  ;;  %v4584_v2 = vld [vmem:[#allocation71_spill] sm:$0xff]  ;;  %v4586_v42 = vld [vmem:[#allocation72_spill] sm:$0xff] }
 0x187   :  { %1852 = vmatprep.subr.mxu1 %v4576_v48  ;;  %1673 = vmatpush2.msra.mxu0 %v4577_v46  ;;  %v4585_v13 = vld [vmem:[#allocation63_spill] sm:$0xff]  ;;  %v4587_v48 = vld [vmem:[#allocation64_spill] sm:$0xff]  ;;  %v4588_v46 = vld [vmem:[#allocation73_spill] sm:$0xff] }
 0x188   :  { %1854 = vmatpush2.msra.mxu1 %v4578_v60  ;;  %1676 = vmatprep.subr.mxu0 %v4579_v23  ;;  %v4589_v60 = vld [vmem:[#allocation65_spill] sm:$0xff]  ;;  %v4590_v23 = vld [vmem:[#allocation74_spill] sm:$0xff] }
 0x189   :  { %1856 = vmatprep.subr.mxu1 %v4580_v25  ;;  %1679 = vmatpush2.msra.mxu0 %v4581_v0  ;;  %v4591_v25 = vld [vmem:[#allocation66_spill] sm:$0xff]  ;;  %v4592_v0 = vld [vmem:[#allocation76_spill] sm:$0xff] }
 0x18a   :  { %1858 = vmatpush2.msra.mxu1 %v4582_v26  ;;  %1682 = vmatprep.subr.mxu0 %v4583_v12  ;;  %v4593_v26 = vld [vmem:[#allocation67_spill] sm:$0xff] }
 0x18b   :  { %1860 = vmatprep.subr.mxu1 %v4584_v2  ;;  %1685 = vmatpush2.msra.mxu0 %v4585_v13  ;;  %v4594_v2 = vld [vmem:[#allocation68_spill] sm:$0xff] }
 0x18c   :  { %1862 = vmatpush2.msra.mxu1 %v4586_v42  ;;  %1688 = vmatprep.subr.mxu0 %v4587_v48  ;;  %v4595_v42 = vld [vmem:[#allocation70_spill] sm:$0xff]  ;;  %v4596_v48 = vld [vmem:[#allocation85_spill] sm:$0xff] }
 0x18d   :  { %1864 = vmatprep.subr.mxu1 %v4588_v46  ;;  %1691 = vmatpush2.msra.mxu0 %v4589_v60  ;;  %v4597_v46 = vld [vmem:[#allocation75_spill] sm:$0xff] }
 0x18e   :  { %1866 = vmatpush2.msra.mxu1 %v4590_v23  ;;  %1694 = vmatprep.subr.mxu0 %v4591_v25  ;;  %v4598_v23 = vld [vmem:[#allocation79_spill] sm:$0xff] }
 0x18f   :  { %1868 = vmatprep.subr.mxu1 %v4592_v0  ;;  %1697 = vmatpush2.msra.mxu0 %v4593_v26  ;;  %v4599_v0 = vld [vmem:[#allocation80_spill] sm:$0xff]  ;;  %v4600_v26 = vld [vmem:[#allocation89_spill] sm:$0xff] }
 0x190   :  { %1870 = vmatpush2.msra.mxu1 %v3516_v34  ;;  %1700 = vmatprep.subr.mxu0 %v4594_v2  ;;  %v4601_v34 = vld [vmem:[#allocation81_spill] sm:$0xff]  ;;  %v4602_v2 = vld [vmem:[#allocation90_spill] sm:$0xff] }
 0x191   :  { %1872 = vmatprep.subr.mxu1 %v3518_v47  ;;  %1703 = vmatpush2.msra.mxu0 %v4595_v42  ;;  %v4603_v47 = vld [vmem:[#allocation82_spill] sm:$0xff]  ;;  %v4604_v42 = vld [vmem:[#allocation92_spill] sm:$0xff] }
 0x192   :  { %1874 = vmatpush2.msra.mxu1 %v4596_v48  ;;  %1706 = vmatprep.subr.mxu0 %v4597_v46  ;;  %v4605_v48 = vld [vmem:[#allocation83_spill] sm:$0xff]  ;;  %v4606_v46 = vld [vmem:[#allocation93_spill] sm:$0xff] }
 0x193   :  { %1876 = vmatprep.subr.mxu1 %v3579_v11  ;;  %1709 = vmatpush2.msra.mxu0 %v4598_v23  ;;  %v4607_v11 = vld [vmem:[#allocation84_spill] sm:$0xff]  ;;  %v4608_v23 = vld [vmem:[#allocation94_spill] sm:$0xff] }
 0x194   :  { %1878 = vmatpush2.msra.mxu1 %v3585_v10  ;;  %1712 = vmatprep.subr.mxu0 %v4599_v0  ;;  %v4609_v10 = vld [vmem:[#allocation86_spill] sm:$0xff]  ;;  %v4610_v0 = vld [vmem:[#allocation101_spill] sm:$0xff] }
 0x195   :  { %1880 = vmatprep.subr.mxu1 %v4600_v26  ;;  %1715 = vmatpush2.msra.mxu0 %v4601_v34  ;;  %v4611_v26 = vld [vmem:[#allocation91_spill] sm:$0xff] }
 0x196   :  { %1882 = vmatpush2.msra.mxu1 %v4602_v2  ;;  %1718 = vmatprep.subr.mxu0 %v4603_v47  ;;  %v4612_v2 = vand.u32 4294901760, %v3679_v54  ;;  %v4613_v47 = vld [vmem:[#allocation9_spill] sm:$0xff] }
 0x197   :  { %1884 = vmatprep.subr.mxu1 %v4604_v42  ;;  %1721 = vmatpush2.msra.mxu0 %v4605_v48  ;;  %v4614_v42 = vld [vmem:[#allocation95_spill] sm:$0xff] }
 0x198   :  { %1886 = vmatpush2.msra.mxu1 %v4606_v46  ;;  %1724 = vmatprep.subr.mxu0 %v4607_v11  ;;  %v4615_v11 = vld [vmem:[#allocation96_spill] sm:$0xff] }
 0x199   :  { %1888 = vmatprep.subr.mxu1 %v4608_v23  ;;  %1727 = vmatpush2.msra.mxu0 %v4609_v10  ;;  %v4616_v10 = vld [vmem:[#allocation97_spill] sm:$0xff] }
 0x19a   :  { %1890 = vmatpush2.msra.mxu1 %v4610_v0  ;;  %1730 = vmatprep.subr.mxu0 %v4611_v26  ;;  %v4617_v26 = vld [vmem:[#allocation98_spill] sm:$0xff] }
 0x19b   :  { %1898 = vmatmul.mubr.f32.vlgmr.msra.gmra.mxu1 %v4612_v2  ;;  %2170 = vmatprep.subr.mxu1 %v4613_v47  ;;  %v4618_v2 = vld [vmem:[#allocation99_spill] sm:$0xff]  ;;  %v4619_v47 = vld [vmem:[#allocation100_spill] sm:$0xff] }
 0x19c   :  { %1733 = vmatpush2.msra.mxu0 %v4614_v42  ;;  %2172 = vmatpush1.msra.mxu1 %v3025_v37  ;;  %v4620_v37 = vld [vmem:[#allocation102_spill] sm:$0xff] }
 0x19d   :  { %2298 = vmatprep.mubr.f32.mxu1 %v3681_v30  ;;  %1736 = vmatprep.subr.mxu0 %v4615_v11 }
 0x19e   :  { %2174 = vmatprep.subr.mxu1 %v3027_v62  ;;  %1739 = vmatpush2.msra.mxu0 %v4616_v10  ;;  %v4621_v62 = vld [vmem:[#allocation24_spill] sm:$0xff] }
 0x19f   :  { %2176 = vmatpush1.msra.mxu1 %v3029_v1  ;;  %1742 = vmatprep.subr.mxu0 %v4617_v26  ;;  %v4622_v1 = vand.u32 4294901760, %v4621_v62 }
 0x1a0   :  { %2178 = vmatprep.subr.mxu1 %v3034_v15  ;;  %1745 = vmatpush2.msra.mxu0 %v4618_v2  ;;  %v4623_v15 = vand.u32 4294901760, %v3042_v9  ;;  %v4627_v9 = vand.u32 4294901760, %v3058_v39  ;;  %v4631_v39 = vand.u32 4294901760, %v3122_v51  ;;  %v4642_v51 = vand.u32 4294901760, %v4543_v7  ;;  %v4668_v7 = vld [vmem:[#allocation35_spill] sm:$0xff] }
 0x1a1   :  { %2180 = vmatpush1.msra.mxu1 %v3036_v49  ;;  %1748 = vmatprep.subr.mxu0 %v4619_v47  ;;  %v4624_v49 = vand.u32 4294901760, %v3045_v35  ;;  %v4628_v35 = vand.u32 4294901760, %v3061_v40  ;;  %v4632_v40 = vand.u32 4294901760, %v3125_v14  ;;  %v4643_v14 = vld [vmem:[#allocation26_spill] sm:$0xff]  ;;  %v4669_v62 = vand.u32 4294901760, %v4668_v7 }
 0x1a2   :  { %2182 = vmatprep.subr.mxu1 %v3038_v55  ;;  %1751 = vmatpush2.msra.mxu0 %v4620_v37  ;;  %v4625_v55 = vand.u32 4294901760, %v3048_v33  ;;  %v4629_v33 = vand.u32 4294901760, %v3068_v29  ;;  %v4633_v29 = vand.u32 4294901760, %v3128_v20  ;;  %v4644_v20 = vld [vmem:[#allocation21_spill] sm:$0xff]  ;;  %v4718_v7 = vld [vmem:[#allocation70_spill] sm:$0xff] }
 0x1a3   :  { %2184 = vmatpush1.msra.mxu1 %v3050_v52  ;;  %1757 = vmatmul.mubr.f32.vlgmr.msra.gmra.mxu0 %v3679_v54  ;;  %v4626_v52 = vand.u32 4294901760, %v3055_v57  ;;  %v4630_v57 = vand.u32 4294901760, %v3112_v8  ;;  %v4638_v8 = vand.u32 4294901760, %v4535_v3 }
 0x1a4   :  { %1907 = vmatprep.subr.mxu0 %v4622_v1  ;;  %2186 = vmatprep.subr.mxu1 %v3103_v43  ;;  %v4634_v43 = vand.u32 4294901760, %v3133_v22  ;;  %v4645_v22 = vand.u32 4294901760, %v4644_v20  ;;  %v4670_v1 = vld [vmem:[#allocation45_spill] sm:$0xff]  ;;  %v4692_v20 = vld [vmem:[#allocation51_spill] sm:$0xff] }
 0x1a5   :  { %1911 = vmatpush1.msra.mxu0 %v4623_v15  ;;  %2161 = vmatprep.mubr.f32.mxu0 %v3681_v30  ;;  %v4655_v30 = vld [vmem:[#allocation39_spill] sm:$0xff]  ;;  %v4671_v15 = vld [vmem:[#allocation36_spill] sm:$0xff] }
 0x1a6   :  { %2188 = vmatpush1.msra.mxu1 %v3105_v53  ;;  %1915 = vmatprep.subr.mxu0 %v4624_v49  ;;  %v4635_v53 = vand.u32 4294901760, %v3136_v27  ;;  %v4646_v27 = vld [vmem:[#allocation29_spill] sm:$0xff]  ;;  %v4672_v49 = vand.u32 4294901760, %v4671_v15  ;;  %v4723_v15 = vld [vmem:[#allocation87_spill] sm:$0xff] }
 0x1a7   :  { %2190 = vmatprep.subr.mxu1 %v3107_v58  ;;  %1919 = vmatpush1.msra.mxu0 %v4625_v55  ;;  %v4636_v58 = vand.u32 4294901760, %v4531_v44  ;;  %v4656_v44 = vld [vmem:[#allocation31_spill] sm:$0xff]  ;;  %v4673_v55 = vld [vmem:[#allocation46_spill] sm:$0xff] }
 0x1a8   :  { %2192 = vmatpush1.msra.mxu1 %v3109_v59  ;;  %1923 = vmatprep.subr.mxu0 %v4626_v52  ;;  %v4637_v59 = vand.u32 4294901760, %v4533_v4  ;;  %v4658_v4 = vld [vmem:[#allocation40_spill] sm:$0xff]  ;;  %v4674_v52 = vld [vmem:[#allocation38_spill] sm:$0xff] }
 0x1a9   :  { %2194 = vmatprep.subr.mxu1 %v3114_v28  ;;  %1927 = vmatpush1.msra.mxu0 %v4627_v9  ;;  %v4639_v28 = vand.u32 4294901760, %v4537_v16  ;;  %v4662_v16 = vld [vmem:[#allocation33_spill] sm:$0xff]  ;;  %v4675_v9 = vand.u32 4294901760, %v4674_v52  ;;  %v4726_v52 = vld [vmem:[#allocation88_spill] sm:$0xff] }
 0x1aa   :  { %2196 = vmatpush1.msra.mxu1 %v3116_v50  ;;  %1931 = vmatprep.subr.mxu0 %v4628_v35  ;;  %v4640_v50 = vand.u32 4294901760, %v4539_v63  ;;  %v4664_v63 = vld [vmem:[#allocation42_spill] sm:$0xff]  ;;  %v4676_v35 = vld [vmem:[#allocation53_spill] sm:$0xff] }
 0x1ab   :  { %2198 = vmatprep.subr.mxu1 %v3118_v56  ;;  %1935 = vmatpush1.msra.mxu0 %v4629_v33  ;;  %v4641_v56 = vand.u32 4294901760, %v4541_v41  ;;  %v4677_v33 = vld [vmem:[#allocation43_spill] sm:$0xff] }
 0x1ac   :  { %2200 = vmatpush1.msra.mxu1 %v3145_v36  ;;  %1939 = vmatprep.subr.mxu0 %v4630_v57  ;;  %v4649_v36 = vld [vmem:[#allocation30_spill] sm:$0xff]  ;;  %v4678_v57 = vand.u32 4294901760, %v4677_v33  ;;  %v4729_v33 = vld [vmem:[#allocation89_spill] sm:$0xff] }
 0x1ad   :  { %2202 = vmatprep.subr.mxu1 %v3179_v32  ;;  %1943 = vmatpush1.msra.mxu0 %v4631_v39  ;;  %v4679_v39 = vld [vmem:[#allocation55_spill] sm:$0xff] }
 0x1ae   :  { %2204 = vmatpush1.msra.mxu1 %v3185_v5  ;;  %1947 = vmatprep.subr.mxu0 %v4632_v40  ;;  %v4650_v5 = vld [vmem:[#allocation25_spill] sm:$0xff]  ;;  %v4680_v40 = vld [vmem:[#allocation47_spill] sm:$0xff] }
 0x1af   :  { %2206 = vmatprep.subr.mxu1 %v3187_v6  ;;  %1951 = vmatpush1.msra.mxu0 %v4633_v29  ;;  %v4651_v6 = vand.u32 4294901760, %v4650_v5  ;;  %v4681_v29 = vand.u32 4294901760, %v4680_v40  ;;  %v4698_v5 = vld [vmem:[#allocation54_spill] sm:$0xff] }
 0x1b0   :  { %2208 = vmatpush1.msra.mxu1 %v3189_v19  ;;  %1955 = vmatprep.subr.mxu0 %v4634_v43  ;;  %v4647_v19 = vld [vmem:[#allocation22_spill] sm:$0xff]  ;;  %v4682_v43 = vld [vmem:[#allocation56_spill] sm:$0xff] }
 0x1b1   :  { %2210 = vmatprep.subr.mxu1 %v3194_v17  ;;  %1959 = vmatpush1.msra.mxu0 %v4635_v53  ;;  %v4648_v32 = vand.u32 4294901760, %v4647_v19  ;;  %v4652_v17 = vld [vmem:[#allocation37_spill] sm:$0xff]  ;;  %v4683_v53 = vld [vmem:[#allocation48_spill] sm:$0xff]  ;;  %v4732_v40 = vld [vmem:[#allocation82_spill] sm:$0xff] }
 0x1b2   :  { %2212 = vmatpush1.msra.mxu1 %v3196_v18  ;;  %1963 = vmatprep.subr.mxu0 %v4636_v58  ;;  %v4653_v18 = vld [vmem:[#allocation20_spill] sm:$0xff]  ;;  %v4684_v58 = vand.u32 4294901760, %v4683_v53  ;;  %v4735_v53 = vand.u32 4294901760, %v4605_v48  ;;  %v4743_v48 = vand.u32 4294901760, %v4614_v42 }
 0x1b3   :  { %2214 = vmatprep.subr.mxu1 %v4532_v61  ;;  %1967 = vmatpush1.msra.mxu0 %v4637_v59  ;;  %v4654_v54 = vand.u32 4294901760, %v4653_v18  ;;  %v4657_v61 = vand.u32 4294901760, %v4656_v44  ;;  %v4685_v59 = vld [vmem:[#allocation57_spill] sm:$0xff]  ;;  %v4695_v19 = vld [vmem:[#allocation52_spill] sm:$0xff]  ;;  %v4701_v18 = vand.u32 4294901760, %v4583_v12  ;;  %v4710_v12 = vand.u32 4294901760, %v4591_v25 }
 0x1b4   :  { %2216 = vmatpush1.msra.mxu1 %v4534_v38  ;;  %1971 = vmatprep.subr.mxu0 %v4638_v8  ;;  %v4659_v38 = vld [vmem:[#allocation32_spill] sm:$0xff]  ;;  %v4686_v8 = vld [vmem:[#allocation49_spill] sm:$0xff] }
 0x1b5   :  { %2218 = vmatprep.subr.mxu1 %v4536_v31  ;;  %1975 = vmatpush1.msra.mxu0 %v4639_v28  ;;  %v4660_v3 = vand.u32 4294901760, %v4659_v38  ;;  %v4661_v31 = vld [vmem:[#allocation41_spill] sm:$0xff]  ;;  %v4687_v28 = vand.u32 4294901760, %v4686_v8  ;;  %v4704_v44 = vld [vmem:[#allocation72_spill] sm:$0xff]  ;;  %v4738_v8 = vld [vmem:[#allocation86_spill] sm:$0xff] }
 0x1b6   :  { %2220 = vmatpush1.msra.mxu1 %v4538_v24  ;;  %1979 = vmatprep.subr.mxu0 %v4640_v50  ;;  %v4663_v24 = vand.u32 4294901760, %v4662_v16  ;;  %v4688_v50 = vld [vmem:[#allocation58_spill] sm:$0xff]  ;;  %v4707_v38 = vld [vmem:[#allocation73_spill] sm:$0xff]  ;;  %v4711_v16 = vld [vmem:[#allocation76_spill] sm:$0xff] }
 0x1b7   :  { %2222 = vmatprep.subr.mxu1 %v4540_v45  ;;  %1983 = vmatpush1.msra.mxu0 %v4641_v56  ;;  %v4665_v45 = vld [vmem:[#allocation34_spill] sm:$0xff] }
 0x1b8   :  { %2224 = vmatpush1.msra.mxu1 %v4542_v21  ;;  %1987 = vmatprep.subr.mxu0 %v4642_v51  ;;  %v4666_v41 = vand.u32 4294901760, %v4665_v45  ;;  %v4667_v21 = vld [vmem:[#allocation44_spill] sm:$0xff]  ;;  %v4689_v56 = vld [vmem:[#allocation50_spill] sm:$0xff] }
 0x1b9   :  { %2226 = vmatprep.subr.mxu1 %v4643_v14  ;;  %1991 = vmatpush1.msra.mxu0 %v4645_v22  ;;  %v4690_v51 = vand.u32 4294901760, %v4689_v56  ;;  %v4691_v14 = vld [vmem:[#allocation60_spill] sm:$0xff]  ;;  %v4693_v22 = vand.u32 4294901760, %v4692_v20  ;;  %v4749_v20 = vand.u32 4294901760, %v4620_v37 }
 0x1ba   :  { %2228 = vmatpush1.msra.mxu1 %v4646_v27  ;;  %1995 = vmatprep.subr.mxu0 %v4648_v32  ;;  %v4694_v27 = vld [vmem:[#allocation61_spill] sm:$0xff]  ;;  %v4696_v32 = vand.u32 4294901760, %v4695_v19  ;;  %v4715_v45 = vld [vmem:[#allocation68_spill] sm:$0xff] }
 0x1bb   :  { %2230 = vmatprep.subr.mxu1 %v4649_v36  ;;  %1999 = vmatpush1.msra.mxu0 %v4651_v6  ;;  %v4697_v36 = vld [vmem:[#allocation62_spill] sm:$0xff]  ;;  %v4699_v6 = vand.u32 4294901760, %v4698_v5  ;;  %v4742_v56 = vld [vmem:[#allocation104_spill] sm:$0xff] }
 0x1bc   :  { %2232 = vmatpush1.msra.mxu1 %v4652_v17  ;;  %2003 = vmatprep.subr.mxu0 %v4654_v54  ;;  %v4700_v17 = vld [vmem:[#allocation69_spill] sm:$0xff]  ;;  %v4702_v54 = vld [vmem:[#allocation71_spill] sm:$0xff] }
 0x1bd   :  { %2234 = vmatprep.subr.mxu1 %v4655_v30  ;;  %2007 = vmatpush1.msra.mxu0 %v4657_v61  ;;  %v4703_v30 = vand.u32 4294901760, %v4585_v13  ;;  %v4705_v61 = vld [vmem:[#allocation64_spill] sm:$0xff] }
 0x1be   :  { %2236 = vmatpush2.msra.mxu1 %v4658_v4  ;;  %2011 = vmatprep.subr.mxu0 %v4660_v3  ;;  %v4706_v4 = vand.u32 4294901760, %v4705_v61  ;;  %v4708_v3 = vand.u32 4294901760, %v4589_v60  ;;  %v4719_v60 = vand.u32 4294901760, %v4718_v7 }
 0x1bf   :  { %2238 = vmatprep.subr.mxu1 %v4661_v31  ;;  %2015 = vmatpush1.msra.mxu0 %v4663_v24  ;;  %v4709_v31 = vld [vmem:[#allocation74_spill] sm:$0xff]  ;;  %v4712_v24 = vld [vmem:[#allocation67_spill] sm:$0xff] }
 0x1c0   :  { %2240 = vmatpush2.msra.mxu1 %v4664_v63  ;;  %2019 = vmatprep.subr.mxu0 %v4666_v41  ;;  %v4713_v13 = vand.u32 4294901760, %v4712_v24  ;;  %v4714_v63 = vld [vmem:[#allocation77_spill] sm:$0xff]  ;;  %v4716_v41 = vand.u32 4294901760, %v4715_v45 }
 0x1c1   :  { %2242 = vmatprep.subr.mxu1 %v4667_v21  ;;  %2023 = vmatpush1.msra.mxu0 %v4669_v62  ;;  %v4717_v21 = vld [vmem:[#allocation78_spill] sm:$0xff]  ;;  %v4720_v62 = vld [vmem:[#allocation85_spill] sm:$0xff] }
 0x1c2   :  { %2244 = vmatpush2.msra.mxu1 %v4670_v1  ;;  %2027 = vmatprep.subr.mxu0 %v4672_v49  ;;  %v4721_v1 = vld [vmem:[#allocation75_spill] sm:$0xff] }
 0x1c3   :  { %2246 = vmatprep.subr.mxu1 %v4673_v55  ;;  %2031 = vmatpush1.msra.mxu0 %v4675_v9  ;;  %v4722_v25 = vand.u32 4294901760, %v4721_v1  ;;  %v4724_v49 = vld [vmem:[#allocation79_spill] sm:$0xff]  ;;  %v4727_v9 = vld [vmem:[#allocation80_spill] sm:$0xff] }
 0x1c4   :  { %2248 = vmatpush2.msra.mxu1 %v4676_v35  ;;  %2035 = vmatprep.subr.mxu0 %v4678_v57  ;;  %v4725_v55 = vand.u32 4294901760, %v4724_v49  ;;  %v4728_v35 = vand.u32 4294901760, %v4727_v9  ;;  %v4730_v57 = vand.u32 4294901760, %v4601_v34  ;;  %v4739_v34 = vand.u32 4294901760, %v4738_v8 }
 0x1c5   :  { %2250 = vmatprep.subr.mxu1 %v4679_v39  ;;  %2039 = vmatpush2.msra.mxu0 %v4681_v29  ;;  %v4731_v39 = vld [vmem:[#allocation90_spill] sm:$0xff]  ;;  %v4733_v29 = vand.u32 4294901760, %v4732_v40 }
 0x1c6   :  { %2252 = vmatpush2.msra.mxu1 %v4682_v43  ;;  %2043 = vmatprep.subr.mxu0 %v4684_v58  ;;  %v4734_v43 = vld [vmem:[#allocation92_spill] sm:$0xff] }
 0x1c7   :  { %2254 = vmatprep.subr.mxu1 %v4685_v59  ;;  %2047 = vmatpush2.msra.mxu0 %v4687_v28  ;;  %v4736_v58 = vld [vmem:[#allocation84_spill] sm:$0xff]  ;;  %v4740_v28 = vld [vmem:[#allocation91_spill] sm:$0xff] }
 0x1c8   :  { %2256 = vmatpush2.msra.mxu1 %v4688_v50  ;;  %2051 = vmatprep.subr.mxu0 %v4690_v51  ;;  %v4737_v59 = vand.u32 4294901760, %v4736_v58  ;;  %v4741_v50 = vand.u32 4294901760, %v4740_v28  ;;  %v4745_v51 = vand.u32 4294901760, %v4616_v10 }
 0x1c9   :  { %2258 = vmatprep.subr.mxu1 %v4691_v14  ;;  %2055 = vmatpush2.msra.mxu0 %v4693_v22  ;;  %v4747_v14 = vand.u32 4294901760, %v4618_v2 }
 0x1ca   :  { %2260 = vmatpush2.msra.mxu1 %v4694_v27  ;;  %2059 = vmatprep.subr.mxu0 %v4696_v32 }
 0x1cb   :  { %2262 = vmatprep.subr.mxu1 %v4697_v36  ;;  %2063 = vmatpush2.msra.mxu0 %v4699_v6 }
 0x1cc   :  { %2264 = vmatpush2.msra.mxu1 %v4700_v17  ;;  %2067 = vmatprep.subr.mxu0 %v4701_v18 }
 0x1cd   :  { %2266 = vmatprep.subr.mxu1 %v4702_v54  ;;  %2071 = vmatpush2.msra.mxu0 %v4703_v30  ;;  %v4750_v30 = vld [vmem:[#allocation103_spill] sm:$0xff] }
 0x1ce   :  { %2268 = vmatpush2.msra.mxu1 %v4704_v44  ;;  %2075 = vmatprep.subr.mxu0 %v4706_v4  ;;  %v4751_v44 = vsub.s32 0, %v4750_v30 }
 0x1cf   :  { %2270 = vmatprep.subr.mxu1 %v4707_v38  ;;  %2079 = vmatpush2.msra.mxu0 %v4708_v3 }
 0x1d0   :  { %2272 = vmatpush2.msra.mxu1 %v4709_v31  ;;  %2083 = vmatprep.subr.mxu0 %v4710_v12  ;;  %v4752_v12 = vsub.s32 1, %v4750_v30 }
 0x1d1   :  { %2274 = vmatprep.subr.mxu1 %v4711_v16  ;;  %2087 = vmatpush2.msra.mxu0 %v4713_v13 }
 0x1d2   :  { %2276 = vmatpush2.msra.mxu1 %v4714_v63  ;;  %2091 = vmatprep.subr.mxu0 %v4716_v41 }
 0x1d3   :  { %2278 = vmatprep.subr.mxu1 %v4717_v21  ;;  %2095 = vmatpush2.msra.mxu0 %v4719_v60 }
 0x1d4   :  { %2280 = vmatpush2.msra.mxu1 %v4720_v62  ;;  %2099 = vmatprep.subr.mxu0 %v4722_v25 }
 0x1d5   :  { %2282 = vmatprep.subr.mxu1 %v4723_v15  ;;  %2103 = vmatpush2.msra.mxu0 %v4725_v55 }
 0x1d6   :  { %2284 = vmatpush2.msra.mxu1 %v4726_v52  ;;  %2107 = vmatprep.subr.mxu0 %v4728_v35 }
 0x1d7   :  { %2286 = vmatprep.subr.mxu1 %v4729_v33  ;;  %2111 = vmatpush2.msra.mxu0 %v4730_v57 }
 0x1d8   :  { %2288 = vmatpush2.msra.mxu1 %v4731_v39  ;;  %2115 = vmatprep.subr.mxu0 %v4733_v29 }
 0x1d9   :  { %2290 = vmatprep.subr.mxu1 %v4734_v43  ;;  %2119 = vmatpush2.msra.mxu0 %v4735_v53 }
 0x1da   :  { %2292 = vmatpush2.msra.mxu1 %v4606_v46  ;;  %2123 = vmatprep.subr.mxu0 %v4737_v59  ;;  %v4744_v46 = vand.u32 4294901760, %v4615_v11 }
 0x1db   :  { %2294 = vmatprep.subr.mxu1 %v4608_v23  ;;  %2127 = vmatpush2.msra.mxu0 %v4739_v34  ;;  %v4746_v23 = vand.u32 4294901760, %v4617_v26 }
 0x1dc   :  { %2296 = vmatpush2.msra.mxu1 %v4610_v0  ;;  %2131 = vmatprep.subr.mxu0 %v4741_v50  ;;  %v4748_v0 = vand.u32 4294901760, %v4619_v47  ;;  %v2315_v47 = vld [vmem:[%s4032_s4] sm:$0x3] }
 0x1dd   :  { %2300 = vmatmul.mubr.f32.vlgmr.msra.gmra.mxu1 %v4742_v56  ;;  %2135 = vmatpush2.msra.mxu0 %v4743_v48  ;;  %v2320_v61 = vrot.slane %v2315_v47, %v4751_v44  ;;  %v2324_v16 = vrot.slane %v2315_v47, %v4752_v12 }
 0x1de   :  { %2139 = vmatprep.subr.mxu0 %v4744_v46 }
 0x1df   :  { %2143 = vmatpush2.msra.mxu0 %v4745_v51 }
 0x1e0   :  { %2147 = vmatprep.subr.mxu0 %v4746_v23 }
 0x1e1   :  { %2151 = vmatpush2.msra.mxu0 %v4747_v14 }
 0x1e2   :  { %2155 = vmatprep.subr.mxu0 %v4748_v0 }
 0x1e3   :  { %2159 = vmatpush2.msra.mxu0 %v4749_v20 }
 0x1e4   :  { %2163 = vmatmul.mubr.f32.vlgmr.msra.gmra.mxu0 %v4742_v56 }
 0x21a   :  { %v1555_v11 = vpop.f32.mrf.mxu1 }
 0x21c   :  { %v1557_v10 = vpop.f32.mrf.mxu1 }
 0x222   :  { %v1162_v42 = vpop.f32.mrf.mxu0 }
 0x223   :  { %v1556_v19 = vadd.f32 %v1555_v11, %v1162_v42 }
 0x224   :  { %v1164_v22 = vpop.f32.mrf.mxu0 }
 0x225   :  { %v1558_v36 = vadd.f32 %v1557_v10, %v1164_v22 }
 0x25b   :  { %v1899_v32 = vpop.f32.mrf.mxu1 }
 0x25d   :  { %v1901_v6 = vpop.f32.mrf.mxu1 }
 0x263   :  { %v1758_v27 = vpop.f32.mrf.mxu0 }
 0x264   :  { %v1759_v5 = vadd.f32 %v1758_v27, %v1556_v19 }
 0x265   :  { %v1760_v26 = vpop.f32.mrf.mxu0 }
 0x266   :  { %v1761_v2 = vadd.f32 %v1760_v26, %v1558_v36  ;;  %v1900_v37 = vadd.f32 %v1899_v32, %v1759_v5 }
 0x268   :  { %v1902_v4 = vadd.f32 %v1901_v6, %v1761_v2 }
 0x29d   :  { %v2301_v17 = vpop.f32.mrf.mxu1 }
 0x29f   :  { %v2303_v24 = vpop.f32.mrf.mxu1 }
 0x2a4   :  { %v2164_v18 = vpop.f32.mrf.mxu0 }
 0x2a5   :  { %v2165_v54 = vadd.f32 %v2164_v18, %v1900_v37 }
 0x2a6   :  { %v2166_v38 = vpop.f32.mrf.mxu0 }
 0x2a7   :  { %v2302_v3 = vadd.f32 %v2301_v17, %v2165_v54  ;;  %v2167_v31 = vadd.f32 %v2166_v38, %v1902_v4 }
 0x2a9   :  { %v2327_v13 = vadd.f32 %v2320_v61, %v2302_v3  ;;  %v2304_v63 = vadd.f32 %v2303_v24, %v2167_v31 }
 0x2ab   :  { %2329 = vst [vmem:[%s4033_s5] sm:$0xff] %v2327_v13  ;;  %v2328_v45 = vadd.f32 %v2324_v16, %v2304_v63 }
 0x2ad   :  { %2330 = vst [vmem:[%s4033_s5 + $0x8] sm:$0xff] %v2328_v45 }
 0x2ae   :  { %2335 = vsyncpa [#allocation4], 1 }
 0x2af   :  { %2336 = vsyncpa [#allocation6], 1 }

</bundles_post_ra>
